<compile_context>
chip_gen: v7x
topology: tpu7x:2x2x1
jax: 0.10.0
libtpu: 0.0.40
codegen_flags: <defaults>
</compile_context>

<pallas_src>
import functools

import jax
import jax.numpy as jnp
from jax.experimental import pallas as pl
from jax.experimental.pallas import tpu as pltpu


def _head_kernel(x_ref, pool_ref, cw_ref, bns_ref, bnb_ref,
                 w1_ref, b1_ref, w2_ref, b2_ref, w3_ref, b3_ref,
                 out_ref, acc_ref):
    """Grid = (head, k). Each step does one K-slice of the 1x1-conv matmul; the
    BN/ReLU/pool/MLP epilogue runs on the last K step of each head."""
    k = pl.program_id(1)
    nk = pl.num_programs(1)

    @pl.when(k == 0)
    def _():
        acc_ref[...] = jnp.zeros_like(acc_ref)

    # 1x1 conv as matmul: bf16 inputs, f32 accumulation on the MXU.
    acc_ref[...] += jnp.dot(x_ref[...], cw_ref[0],
                            preferred_element_type=jnp.float32)

    @pl.when(k == nk - 1)
    def _():
        # Folded eval-mode BatchNorm + ReLU (f32).
        z = jnp.maximum(acc_ref[...] * bns_ref[0] + bnb_ref[0], 0.0)      # (B*HW, 512)

        # AdaptiveAvgPool2d((1,1)) == per-batch mean over the HW rows, expressed as a
        # single small matmul with a (B, B*HW) averaging matrix (works for any HW,
        # no in-kernel reshape / per-batch slicing).
        pooled = jnp.dot(pool_ref[...], z,
                         preferred_element_type=jnp.float32)             # (B, 512)

        # MLP head (dropout is identity in eval mode). Weights are bf16; accumulate f32.
        h1 = jnp.maximum(
            jnp.dot(pooled.astype(jnp.bfloat16), w1_ref[0],
                    preferred_element_type=jnp.float32) + b1_ref[0], 0.0)  # (B, 256)
        h2 = jnp.maximum(
            jnp.dot(h1.astype(jnp.bfloat16), w2_ref[0],
                    preferred_element_type=jnp.float32) + b2_ref[0], 0.0)  # (B, 128)
        logits = jnp.dot(h2.astype(jnp.bfloat16), w3_ref[0],
                         preferred_element_type=jnp.float32) + b3_ref[0]   # (B, ncp)

        out_ref[0] = logits


def multi_head_cnn_mlp_forward(features_nchw, params, *, num_heads, num_class, tk=512):
    """features_nchw: (B, 2048, h, w) float32 backbone features (NCHW, like PyTorch)."""
    B, C, H, W = features_nchw.shape
    HW = H * W
    assert C % tk == 0
    nk = C // tk
    ncp = ((num_class + 127) // 128) * 128     # lane-dense padded class dim

    # TODO(synk): in production, keep the backbone output channels-last to avoid this
    # extra full HBM read+write transpose pass before the kernel.
    x = jnp.transpose(features_nchw, (0, 2, 3, 1)).reshape(B * HW, C)
    x = x.astype(jnp.bfloat16)

    # (B, B*HW) per-batch averaging matrix: row b has 1/HW on its own HW rows.
    row_batch = jnp.repeat(jnp.arange(B), HW)
    pool = (jnp.arange(B)[:, None] == row_batch[None, :]).astype(jnp.float32) / HW

    # Fold eval-mode BatchNorm into per-channel scale/bias (kept in f32).
    eps = 1e-5
    scale = params["bn_gamma"] * jax.lax.rsqrt(params["bn_var"] + eps)     # (heads, 512)
    bias = params["bn_beta"] - params["bn_mean"] * scale                   # (heads, 512)
    bn_scale = scale.reshape(num_heads, 1, 512)
    bn_bias = bias.reshape(num_heads, 1, 512)

    # bf16 weights (halves weight DMA bytes; MXU accumulates in f32).
    conv_w = params["conv_w"].astype(jnp.bfloat16)                         # (heads, 2048, 512)
    w1 = params["w1"].astype(jnp.bfloat16)                                 # (heads, 512, 256)
    w2 = params["w2"].astype(jnp.bfloat16)                                 # (heads, 256, 128)
    w3 = jnp.zeros((num_heads, 128, ncp), jnp.float32)
    w3 = w3.at[:, :, :num_class].set(params["w3"]).astype(jnp.bfloat16)    # (heads, 128, ncp)
    b1 = params["b1"].reshape(num_heads, 1, 256)
    b2 = params["b2"].reshape(num_heads, 1, 128)
    b3 = jnp.zeros((num_heads, 1, ncp), jnp.float32)
    b3 = b3.at[:, :, :num_class].set(params["b3"].reshape(num_heads, 1, num_class))

    flops = 2 * num_heads * (B * HW * C * 512
                             + B * (512 * 256 + 256 * 128 + 128 * ncp))
    bytes_accessed = int(
        x.size * 2 + pool.size * 4
        + conv_w.size * 2
        + (bn_scale.size + bn_bias.size) * 4
        + (w1.size + w2.size + w3.size) * 2
        + (b1.size + b2.size + b3.size) * 4
        + num_heads * B * ncp * 4)
    cost = pl.CostEstimate(flops=flops, transcendentals=0,
                           bytes_accessed=bytes_accessed)

    out = pl.pallas_call(
        _head_kernel,
        out_shape=jax.ShapeDtypeStruct((num_heads, B, ncp), jnp.float32),
        grid_spec=pltpu.PrefetchScalarGridSpec(
            num_scalar_prefetch=0,
            grid=(num_heads, nk),                                   # heads x K-slices
            in_specs=[
                pl.BlockSpec((B * HW, tk), lambda h, k: (0, k)),    # x K-slice (shared)
                pl.BlockSpec((B, B * HW), lambda h, k: (0, 0)),     # averaging matrix
                pl.BlockSpec((1, tk, 512), lambda h, k: (h, k, 0)), # conv weight K-slice
                pl.BlockSpec((1, 1, 512), lambda h, k: (h, 0, 0)),  # bn scale
                pl.BlockSpec((1, 1, 512), lambda h, k: (h, 0, 0)),  # bn bias
                pl.BlockSpec((1, 512, 256), lambda h, k: (h, 0, 0)),  # W1
                pl.BlockSpec((1, 1, 256), lambda h, k: (h, 0, 0)),    # b1
                pl.BlockSpec((1, 256, 128), lambda h, k: (h, 0, 0)),  # W2
                pl.BlockSpec((1, 1, 128), lambda h, k: (h, 0, 0)),    # b2
                pl.BlockSpec((1, 128, ncp), lambda h, k: (h, 0, 0)),  # W3 (lane padded)
                pl.BlockSpec((1, 1, ncp), lambda h, k: (h, 0, 0)),    # b3 (lane padded)
            ],
            out_specs=pl.BlockSpec((1, B, ncp), lambda h, k: (h, 0, 0)),
            scratch_shapes=[pltpu.VMEM((B * HW, 512), jnp.float32)],  # conv accumulator
        ),
        compiler_params=pltpu.CompilerParams(
            dimension_semantics=("parallel", "arbitrary"),  # heads across TCs; K is a reduction
            vmem_limit_bytes=48 * 1024 * 1024,
        ),
        cost_estimate=cost,
    )(x, pool, conv_w, bn_scale, bn_bias, w1, b1, w2, b2, w3, b3)

    out = out[:, :, :num_class]                    # drop lane padding
    # (heads, B, nc) -> (B, heads, nc), matching torch.cat(List, dim=1).view(B, heads, nc)
    h = jnp.transpose(out, (1, 0, 2))
    head_outputs = h.reshape(B, num_heads * num_class)
    return h, head_outputs


def _init_params(key, num_heads, num_class):
    ks = jax.random.split(key, 12)
    s = 0.02
    return {
        # per-head 1x1 conv (2048 -> 512), stored as (heads, 2048, 512) for x @ W
        "conv_w": s * jax.random.normal(ks[0], (num_heads, 2048, 512), jnp.float32),
        # BatchNorm2d(512) eval-mode parameters / running stats
        "bn_gamma": 1.0 + 0.1 * jax.random.normal(ks[1], (num_heads, 512), jnp.float32),
        "bn_beta": 0.1 * jax.random.normal(ks[2], (num_heads, 512), jnp.float32),
        "bn_mean": 0.1 * jax.random.normal(ks[3], (num_heads, 512), jnp.float32),
        "bn_var": 1.0 + 0.1 * jax.random.uniform(ks[4], (num_heads, 512), jnp.float32),
        # MLP: 512 -> 256 -> 128 -> num_class
        "w1": s * jax.random.normal(ks[5], (num_heads, 512, 256), jnp.float32),
        "b1": s * jax.random.normal(ks[6], (num_heads, 256), jnp.float32),
        "w2": s * jax.random.normal(ks[7], (num_heads, 256, 128), jnp.float32),
        "b2": s * jax.random.normal(ks[8], (num_heads, 128), jnp.float32),
        "w3": s * jax.random.normal(ks[9], (num_heads, 128, num_class), jnp.float32),
        "b3": s * jax.random.normal(ks[10], (num_heads, num_class), jnp.float32),
    }


def _reference_forward(features_nchw, params, *, num_heads, num_class,
                       match_kernel_precision=False):
    """Pure-jnp reference. If match_kernel_precision, mimic the kernel's bf16 casts."""
    B, C, H, W = features_nchw.shape
    x = jnp.transpose(features_nchw, (0, 2, 3, 1)).reshape(B, H * W, C)
    if match_kernel_precision:
        x = x.astype(jnp.bfloat16)
    eps = 1e-5
    outs = []
    for h in range(num_heads):
        cw, w1, w2, w3 = params["conv_w"][h], params["w1"][h], params["w2"][h], params["w3"][h]
        if match_kernel_precision:
            cw = cw.astype(jnp.bfloat16)
            w1 = w1.astype(jnp.bfloat16)
            w2 = w2.astype(jnp.bfloat16)
            w3 = w3.astype(jnp.bfloat16)
        z = jnp.einsum("bxc,co->bxo", x, cw, preferred_element_type=jnp.float32)
        scale = params["bn_gamma"][h] * jax.lax.rsqrt(params["bn_var"][h] + eps)
        bias = params["bn_beta"][h] - params["bn_mean"][h] * scale
        z = jnp.maximum(z * scale + bias, 0.0)
        pooled = jnp.mean(z, axis=1)                                   # (B, 512)
        if match_kernel_precision:
            pooled = pooled.astype(jnp.bfloat16)
        h1 = jnp.maximum(jnp.dot(pooled, w1, preferred_element_type=jnp.float32)
                         + params["b1"][h], 0.0)
        if match_kernel_precision:
            h1 = h1.astype(jnp.bfloat16)
        h2 = jnp.maximum(jnp.dot(h1, w2, preferred_element_type=jnp.float32)
                         + params["b2"][h], 0.0)
        if match_kernel_precision:
            h2 = h2.astype(jnp.bfloat16)
        outs.append(jnp.dot(h2, w3, preferred_element_type=jnp.float32) + params["b3"][h])
    head_outputs = jnp.concatenate(outs, axis=1)
    return head_outputs.reshape(B, num_heads, num_class), head_outputs


if __name__ == "__main__":
    num_class = 10
    num_heads = 3
    B, Cfeat, Hf, Wf = 2, 2048, 4, 4   # resnet50 feature map for a small input

    key = jax.random.PRNGKey(0)
    k_feat, k_params = jax.random.split(key)
    features = jax.random.normal(k_feat, (B, Cfeat, Hf, Wf), jnp.float32)
    params = _init_params(k_params, num_heads, num_class)

    fwd = jax.jit(functools.partial(multi_head_cnn_mlp_forward,
                                    num_heads=num_heads, num_class=num_class))
    h, head_outputs = fwd(features, params)
    jax.block_until_ready((h, head_outputs))

    # Reference that mimics the kernel's bf16-weight / f32-accumulate precision.
    h_ref, ho_ref = _reference_forward(features, params, num_heads=num_heads,
                                       num_class=num_class, match_kernel_precision=True)
    # Pure-f32 reference (looser tolerance: bounds the mixed-precision error).
    h_f32, _ = _reference_forward(features, params, num_heads=num_heads,
                                  num_class=num_class, match_kernel_precision=False)

    assert h.shape == (B, num_heads, num_class)
    assert head_outputs.shape == (B, num_heads * num_class)
    assert jnp.allclose(h, h_ref, rtol=1e-3, atol=1e-3)
    assert jnp.allclose(head_outputs, ho_ref, rtol=1e-3, atol=1e-3)
    assert jnp.allclose(h, h_f32, rtol=3e-2, atol=3e-2)

    print("KERNEL_OK")
</pallas_src>

<mosaic_0001>
module attributes {stable_mosaic.version = 11 : i64} {
  func.func @_head_kernel(%arg0: i32, %arg1: i32, %arg2: memref<32x512xbf16, #tpu.memory_space<vmem>>, %arg3: memref<2x32xf32, #tpu.memory_space<vmem>>, %arg4: memref<1x512x512xbf16, #tpu.memory_space<vmem>>, %arg5: memref<1x1x512xf32, #tpu.memory_space<vmem>>, %arg6: memref<1x1x512xf32, #tpu.memory_space<vmem>>, %arg7: memref<1x512x256xbf16, #tpu.memory_space<vmem>>, %arg8: memref<1x1x256xf32, #tpu.memory_space<vmem>>, %arg9: memref<1x256x128xbf16, #tpu.memory_space<vmem>>, %arg10: memref<1x1x128xf32, #tpu.memory_space<vmem>>, %arg11: memref<1x128x128xbf16, #tpu.memory_space<vmem>>, %arg12: memref<1x1x128xf32, #tpu.memory_space<vmem>>, %arg13: memref<1x2x128xf32, #tpu.memory_space<vmem>>, %arg14: memref<32x512xf32, #tpu.memory_space<vmem>>) attributes {dimension_semantics = [#tpu.dimension_semantics<parallel>, #tpu.dimension_semantics<arbitrary>], iteration_bounds = array<i64: 3, 4>, scalar_prefetch = 0 : i64, scratch_operands = 1 : i64, tpu.core_type = #tpu.core_type<tc>, window_params = [{transform_indices = @transform_0, window_bounds = array<i64: 32, 512>}, {pipeline_mode = #tpu.pipeline_mode<synchronous>, transform_indices = @transform_1, window_bounds = array<i64: 2, 32>}, {transform_indices = @transform_2, window_bounds = array<i64: 1, 512, 512>}, {transform_indices = @transform_3, window_bounds = array<i64: 1, 1, 512>}, {transform_indices = @transform_4, window_bounds = array<i64: 1, 1, 512>}, {transform_indices = @transform_5, window_bounds = array<i64: 1, 512, 256>}, {transform_indices = @transform_6, window_bounds = array<i64: 1, 1, 256>}, {transform_indices = @transform_7, window_bounds = array<i64: 1, 256, 128>}, {transform_indices = @transform_8, window_bounds = array<i64: 1, 1, 128>}, {transform_indices = @transform_9, window_bounds = array<i64: 1, 128, 128>}, {transform_indices = @transform_10, window_bounds = array<i64: 1, 1, 128>}, {transform_indices = @transform_11, window_bounds = array<i64: 1, 2, 128>}]} {
    %c0_i32 = arith.constant 0 : i32
    %0 = arith.cmpi eq, %arg1, %c0_i32 : i32
    %1 = arith.extui %0 : i1 to i32
    %c0_i32_0 = arith.constant 0 : i32
    %2 = arith.cmpi ne, %1, %c0_i32_0 : i32
    scf.if %2 {
      %cst_10 = arith.constant 0.000000e+00 : f32
      %13 = vector.broadcast %cst_10 : f32 to vector<32x512xf32>
      %c0_11 = arith.constant 0 : index
      %c0_12 = arith.constant 0 : index
      %14 = vector.load %arg14[%c0_11, %c0_12] : memref<32x512xf32, #tpu.memory_space<vmem>>, vector<32x512xf32>
      tpu.vector_store %arg14[%c0_11, %c0_12], %13 {strides = array<i32>} : memref<32x512xf32, #tpu.memory_space<vmem>>, vector<32x512xf32>,
    } else {
    }
    %c0 = arith.constant 0 : index
    %c0_1 = arith.constant 0 : index
    %3 = vector.load %arg14[%c0, %c0_1] : memref<32x512xf32, #tpu.memory_space<vmem>>, vector<32x512xf32>
    %c0_2 = arith.constant 0 : index
    %c0_3 = arith.constant 0 : index
    %4 = vector.load %arg2[%c0_2, %c0_3] : memref<32x512xbf16, #tpu.memory_space<vmem>>, vector<32x512xbf16>
    %c0_4 = arith.constant 0 : index
    %c0_5 = arith.constant 0 : index
    %c0_6 = arith.constant 0 : index
    %5 = vector.load %arg4[%c0_4, %c0_5, %c0_6] : memref<1x512x512xbf16, #tpu.memory_space<vmem>>, vector<1x512x512xbf16>
    %6 = vector.shape_cast %5 : vector<1x512x512xbf16> to vector<512x512xbf16>
    %cst = arith.constant dense<0.000000e+00> : vector<32x512xf32>
    %7 = tpu.matmul %4, %6, %cst {dimension_numbers = #tpu.dot_dimension_numbers<[1], [0], [0], [1], [0, 0, 1, 1], [], []>} : vector<32x512xbf16>, vector<512x512xbf16>, vector<32x512xf32> -> vector<32x512xf32>
    %8 = arith.addf %3, %7 : vector<32x512xf32>
    %c0_7 = arith.constant 0 : index
    %c0_8 = arith.constant 0 : index
    %9 = vector.load %arg14[%c0_7, %c0_8] : memref<32x512xf32, #tpu.memory_space<vmem>>, vector<32x512xf32>
    tpu.vector_store %arg14[%c0_7, %c0_8], %8 {strides = array<i32>} : memref<32x512xf32, #tpu.memory_space<vmem>>, vector<32x512xf32>,
    %c3_i32 = arith.constant 3 : i32
    %10 = arith.cmpi eq, %arg1, %c3_i32 : i32
    %11 = arith.extui %10 : i1 to i32
    %c0_i32_9 = arith.constant 0 : i32
    %12 = arith.cmpi ne, %11, %c0_i32_9 : i32
    scf.if %12 {
      %c0_10 = arith.constant 0 : index
      %c0_11 = arith.constant 0 : index
      %13 = vector.load %arg14[%c0_10, %c0_11] : memref<32x512xf32, #tpu.memory_space<vmem>>, vector<32x512xf32>
      %c0_12 = arith.constant 0 : index
      %c0_13 = arith.constant 0 : index
      %c0_14 = arith.constant 0 : index
      %14 = vector.load %arg5[%c0_12, %c0_13, %c0_14] : memref<1x1x512xf32, #tpu.memory_space<vmem>>, vector<1x1x512xf32>
      %15 = vector.shape_cast %14 : vector<1x1x512xf32> to vector<1x512xf32>
      %16 = vector.broadcast %15 : vector<1x512xf32> to vector<32x512xf32>
      %17 = arith.mulf %13, %16 : vector<32x512xf32>
      %c0_15 = arith.constant 0 : index
      %c0_16 = arith.constant 0 : index
      %c0_17 = arith.constant 0 : index
      %18 = vector.load %arg6[%c0_15, %c0_16, %c0_17] : memref<1x1x512xf32, #tpu.memory_space<vmem>>, vector<1x1x512xf32>
      %19 = vector.shape_cast %18 : vector<1x1x512xf32> to vector<1x512xf32>
      %20 = vector.broadcast %19 : vector<1x512xf32> to vector<32x512xf32>
      %21 = arith.addf %17, %20 : vector<32x512xf32>
      %cst_18 = arith.constant 0.000000e+00 : f32
      %22 = vector.broadcast %cst_18 : f32 to vector<32x512xf32>
      %23 = arith.maximumf %21, %22 : vector<32x512xf32>
      %c0_19 = arith.constant 0 : index
      %c0_20 = arith.constant 0 : index
      %24 = vector.load %arg3[%c0_19, %c0_20] : memref<2x32xf32, #tpu.memory_space<vmem>>, vector<2x32xf32>
      %cst_21 = arith.constant dense<0.000000e+00> : vector<2x512xf32>
      %25 = tpu.matmul %24, %23, %cst_21 {dimension_numbers = #tpu.dot_dimension_numbers<[1], [0], [0], [1], [0, 0, 1, 1], [], []>} : vector<2x32xf32>, vector<32x512xf32>, vector<2x512xf32> -> vector<2x512xf32>
      %26 = arith.truncf %25 : vector<2x512xf32> to vector<2x512xbf16>
      %c0_22 = arith.constant 0 : index
      %c0_23 = arith.constant 0 : index
      %c0_24 = arith.constant 0 : index
      %27 = vector.load %arg7[%c0_22, %c0_23, %c0_24] : memref<1x512x256xbf16, #tpu.memory_space<vmem>>, vector<1x512x256xbf16>
      %28 = vector.shape_cast %27 : vector<1x512x256xbf16> to vector<512x256xbf16>
      %cst_25 = arith.constant dense<0.000000e+00> : vector<2x256xf32>
      %29 = tpu.matmul %26, %28, %cst_25 {dimension_numbers = #tpu.dot_dimension_numbers<[1], [0], [0], [1], [0, 0, 1, 1], [], []>} : vector<2x512xbf16>, vector<512x256xbf16>, vector<2x256xf32> -> vector<2x256xf32>
      %c0_26 = arith.constant 0 : index
      %c0_27 = arith.constant 0 : index
      %c0_28 = arith.constant 0 : index
      %30 = vector.load %arg8[%c0_26, %c0_27, %c0_28] : memref<1x1x256xf32, #tpu.memory_space<vmem>>, vector<1x1x256xf32>
      %31 = vector.shape_cast %30 : vector<1x1x256xf32> to vector<1x256xf32>
      %32 = vector.broadcast %31 : vector<1x256xf32> to vector<2x256xf32>
      %33 = arith.addf %29, %32 : vector<2x256xf32>
      %cst_29 = arith.constant 0.000000e+00 : f32
      %34 = vector.broadcast %cst_29 : f32 to vector<2x256xf32>
      %35 = arith.maximumf %33, %34 : vector<2x256xf32>
      %36 = arith.truncf %35 : vector<2x256xf32> to vector<2x256xbf16>
      %c0_30 = arith.constant 0 : index
      %c0_31 = arith.constant 0 : index
      %c0_32 = arith.constant 0 : index
      %37 = vector.load %arg9[%c0_30, %c0_31, %c0_32] : memref<1x256x128xbf16, #tpu.memory_space<vmem>>, vector<1x256x128xbf16>
      %38 = vector.shape_cast %37 : vector<1x256x128xbf16> to vector<256x128xbf16>
      %cst_33 = arith.constant dense<0.000000e+00> : vector<2x128xf32>
      %39 = tpu.matmul %36, %38, %cst_33 {dimension_numbers = #tpu.dot_dimension_numbers<[1], [0], [0], [1], [0, 0, 1, 1], [], []>} : vector<2x256xbf16>, vector<256x128xbf16>, vector<2x128xf32> -> vector<2x128xf32>
      %c0_34 = arith.constant 0 : index
      %c0_35 = arith.constant 0 : index
      %c0_36 = arith.constant 0 : index
      %40 = vector.load %arg10[%c0_34, %c0_35, %c0_36] : memref<1x1x128xf32, #tpu.memory_space<vmem>>, vector<1x1x128xf32>
      %41 = vector.shape_cast %40 : vector<1x1x128xf32> to vector<1x128xf32>
      %42 = vector.broadcast %41 : vector<1x128xf32> to vector<2x128xf32>
      %43 = arith.addf %39, %42 : vector<2x128xf32>
      %cst_37 = arith.constant 0.000000e+00 : f32
      %44 = vector.broadcast %cst_37 : f32 to vector<2x128xf32>
      %45 = arith.maximumf %43, %44 : vector<2x128xf32>
      %46 = arith.truncf %45 : vector<2x128xf32> to vector<2x128xbf16>
      %c0_38 = arith.constant 0 : index
      %c0_39 = arith.constant 0 : index
      %c0_40 = arith.constant 0 : index
      %47 = vector.load %arg11[%c0_38, %c0_39, %c0_40] : memref<1x128x128xbf16, #tpu.memory_space<vmem>>, vector<1x128x128xbf16>
      %48 = vector.shape_cast %47 : vector<1x128x128xbf16> to vector<128x128xbf16>
      %cst_41 = arith.constant dense<0.000000e+00> : vector<2x128xf32>
      %49 = tpu.matmul %46, %48, %cst_41 {dimension_numbers = #tpu.dot_dimension_numbers<[1], [0], [0], [1], [0, 0, 1, 1], [], []>} : vector<2x128xbf16>, vector<128x128xbf16>, vector<2x128xf32> -> vector<2x128xf32>
      %c0_42 = arith.constant 0 : index
      %c0_43 = arith.constant 0 : index
      %c0_44 = arith.constant 0 : index
      %50 = vector.load %arg12[%c0_42, %c0_43, %c0_44] : memref<1x1x128xf32, #tpu.memory_space<vmem>>, vector<1x1x128xf32>
      %51 = vector.shape_cast %50 : vector<1x1x128xf32> to vector<1x128xf32>
      %52 = vector.broadcast %51 : vector<1x128xf32> to vector<2x128xf32>
      %53 = arith.addf %49, %52 : vector<2x128xf32>
      %c0_45 = arith.constant 0 : index
      %c0_46 = arith.constant 0 : index
      %c0_47 = arith.constant 0 : index
      %54 = vector.load %arg13[%c0_45, %c0_46, %c0_47] : memref<1x2x128xf32, #tpu.memory_space<vmem>>, vector<1x2x128xf32>
      %55 = vector.shape_cast %54 : vector<1x2x128xf32> to vector<2x128xf32>
      %56 = vector.shape_cast %53 : vector<2x128xf32> to vector<1x2x128xf32>
      tpu.vector_store %arg13[%c0_45, %c0_46, %c0_47], %56 {strides = array<i32>} : memref<1x2x128xf32, #tpu.memory_space<vmem>>, vector<1x2x128xf32>,
    } else {
    }
    return
  }
  func.func @transform_0(%arg0: i32, %arg1: i32) -> (i32, i32) {
    %c0_i32 = arith.constant 0 : i32
    %c0_i32_0 = arith.constant 0 : i32
    return %c0_i32, %arg1 : i32, i32
  }
  func.func @transform_1(%arg0: i32, %arg1: i32) -> (i32, i32) {
    %c0_i32 = arith.constant 0 : i32
    %c0_i32_0 = arith.constant 0 : i32
    %c0_i32_1 = arith.constant 0 : i32
    return %c0_i32, %c0_i32_0 : i32, i32
  }
  func.func @transform_2(%arg0: i32, %arg1: i32) -> (i32, i32, i32) {
    %c0_i32 = arith.constant 0 : i32
    %c0_i32_0 = arith.constant 0 : i32
    return %arg0, %arg1, %c0_i32 : i32, i32, i32
  }
  func.func @transform_3(%arg0: i32, %arg1: i32) -> (i32, i32, i32) {
    %c0_i32 = arith.constant 0 : i32
    %c0_i32_0 = arith.constant 0 : i32
    %c0_i32_1 = arith.constant 0 : i32
    return %arg0, %c0_i32, %c0_i32_0 : i32, i32, i32
  }
  func.func @transform_4(%arg0: i32, %arg1: i32) -> (i32, i32, i32) {
    %c0_i32 = arith.constant 0 : i32
    %c0_i32_0 = arith.constant 0 : i32
    %c0_i32_1 = arith.constant 0 : i32
    return %arg0, %c0_i32, %c0_i32_0 : i32, i32, i32
  }
  func.func @transform_5(%arg0: i32, %arg1: i32) -> (i32, i32, i32) {
    %c0_i32 = arith.constant 0 : i32
    %c0_i32_0 = arith.constant 0 : i32
    %c0_i32_1 = arith.constant 0 : i32
    return %arg0, %c0_i32, %c0_i32_0 : i32, i32, i32
  }
  func.func @transform_6(%arg0: i32, %arg1: i32) -> (i32, i32, i32) {
    %c0_i32 = arith.constant 0 : i32
    %c0_i32_0 = arith.constant 0 : i32
    %c0_i32_1 = arith.constant 0 : i32
    return %arg0, %c0_i32, %c0_i32_0 : i32, i32, i32
  }
  func.func @transform_7(%arg0: i32, %arg1: i32) -> (i32, i32, i32) {
    %c0_i32 = arith.constant 0 : i32
    %c0_i32_0 = arith.constant 0 : i32
    %c0_i32_1 = arith.constant 0 : i32
    return %arg0, %c0_i32, %c0_i32_0 : i32, i32, i32
  }
  func.func @transform_8(%arg0: i32, %arg1: i32) -> (i32, i32, i32) {
    %c0_i32 = arith.constant 0 : i32
    %c0_i32_0 = arith.constant 0 : i32
    %c0_i32_1 = arith.constant 0 : i32
    return %arg0, %c0_i32, %c0_i32_0 : i32, i32, i32
  }
  func.func @transform_9(%arg0: i32, %arg1: i32) -> (i32, i32, i32) {
    %c0_i32 = arith.constant 0 : i32
    %c0_i32_0 = arith.constant 0 : i32
    %c0_i32_1 = arith.constant 0 : i32
    return %arg0, %c0_i32, %c0_i32_0 : i32, i32, i32
  }
  func.func @transform_10(%arg0: i32, %arg1: i32) -> (i32, i32, i32) {
    %c0_i32 = arith.constant 0 : i32
    %c0_i32_0 = arith.constant 0 : i32
    %c0_i32_1 = arith.constant 0 : i32
    return %arg0, %c0_i32, %c0_i32_0 : i32, i32, i32
  }
  func.func @transform_11(%arg0: i32, %arg1: i32) -> (i32, i32, i32) {
    %c0_i32 = arith.constant 0 : i32
    %c0_i32_0 = arith.constant 0 : i32
    %c0_i32_1 = arith.constant 0 : i32
    return %arg0, %c0_i32, %c0_i32_0 : i32, i32, i32
  }
}

</mosaic_0001>

<bundles_post_ra>
// kernel: eq.11
= control target key start
LH: loop header
LB: loop body
LE: loop exit
PB: predicated region body
PF: predicated region fallthrough
CT: control target
= control target key end

     0   :  { %vm7_vm0 = vcmask 130048   ;;  %vm13_vm1 = vcmask 261248   ;;  %s39_s0 = inlined_call_operand.vmem [shape: s32[2,16], index: 0, kind: input, shape index: {}]   ;;  %s40_s1 = inlined_call_operand.vmem [shape: s32[32], index: 1, kind: output, shape index: {}]  }
   0x1   :  { %v4_v0 = vld [vmem:[%s39_s0] sm:$0x3]  ;;  %s22_s0 = smov 16  }
   0x2   :  { %5 = vst [vmem:[#allocation1] sm:$0x3] %v4_v0 }
   0x9   :  { %v10_v1 = vld [vmem:[#allocation1 + $0x1] sm:$0x1]   ;;  %v6_v2 = vld [vmem:[#allocation1] sm:$0x1]  }
   0xa   :  { %11 = vrot.lane.b32.xlu0 %v10_v1, %s22_s0  ;;  %8 = vst.msk [vmem:[#allocation0] sm:$0x1] %vm7_vm0, %v6_v2  }
  0x7c   :  { %v12_v3 = vpop.permute.xlu0 %11  }
  0x7d   :  { %14 = vst.msk [vmem:[#allocation0] sm:$0x1] %vm13_vm1, %v12_v3  }
  0x84   :  { %v18_v4 = vld [vmem:[#allocation0] sm:$0x1] }
  0x85   :  { %20 = vst [vmem:[%s40_s1] sm:$0x1] %v18_v4 }

// kernel: multi_head_cnn_mlp_forward.1
= control target key start
LH: loop header
LB: loop body
LE: loop exit
PB: predicated region body
PF: predicated region fallthrough
CT: control target
= control target key end

     0   :  { %s4198_s0 = inlined_call_operand.vmem [shape: bf16[32,2048], index: 0, kind: input, shape index: {}]   ;;  %s4199_s1 = inlined_call_operand.vmem [shape: f32[2,32], index: 1, kind: input, shape index: {}]   ;;  %s4200_s2 = inlined_call_operand.vmem [shape: bf16[3,2048,512], index: 2, kind: input, shape index: {}]   ;;  %s4201_s3 = inlined_call_operand.vmem [shape: f32[3,1,512], index: 3, kind: input, shape index: {}]   ;;  %s4202_s4 = inlined_call_operand.vmem [shape: f32[3,1,512], index: 4, kind: input, shape index: {}]   ;;  %s4203_s5 = inlined_call_operand.vmem [shape: bf16[3,512,256], index: 5, kind: input, shape index: {}]   ;;  %s4204_s6 = inlined_call_operand.vmem [shape: f32[3,1,256], index: 6, kind: input, shape index: {}]   ;;  %s4205_s7 = inlined_call_operand.vmem [shape: bf16[3,256,128], index: 7, kind: input, shape index: {}]   ;;  %s4206_s8 = inlined_call_operand.vmem [shape: f32[3,1,128], index: 8, kind: input, shape index: {}]   ;;  %s4207_s9 = inlined_call_operand.vmem [shape: bf16[3,128,128], index: 9, kind: input, shape index: {}]   ;;  %s4208_s10 = inlined_call_operand.vmem [shape: f32[3,1,128], index: 10, kind: input, shape index: {}]   ;;  %s4209_s11 = inlined_call_operand.vmem [shape: f32[3,2,128], index: 11, kind: output, shape index: {}]  }
   0x1   :  { %4215 = sst [smem:[#allocation11_spill]] %s4198_s0 }
   0x2   :  { %4216 = sst [smem:[#allocation12_spill]] %s4199_s1 }
   0x3   :  { %4217 = sst [smem:[#allocation13_spill]] %s4200_s2 }
   0x4   :  { %4218 = sst [smem:[#allocation14_spill]] %s4201_s3 }
   0x5   :  { %4219 = sst [smem:[#allocation15_spill]] %s4202_s4 }
   0x6   :  { %4220 = sst [smem:[#allocation16_spill]] %s4203_s5 }
   0x7   :  { %s3772_s17 = smov 0   ;;  %s3774_s18 = smov 0  }
   0x8   :  { %s3776_s19 = smov 0   ;;  %s3778_s20 = smov 0  }
   0x9   :  { %s3780_s21 = smov 0   ;;  %s3782_s22 = smov 0  }
   0xa   :  { %s3784_s23 = smov 0  }
   0xb LB: > { %4221 = sst [smem:[#allocation4_spill]] %s3687_s18  ;;  %s30_s24 = sadd.s32 1, %s3699_s21  ;;  %s3707_s23 = sphi %s3784_s23, %s21_s23   ;;  %s3703_s22 = sphi %s3782_s22, %s4240_s22   ;;  %s3699_s21 = sphi %s3780_s21, %s4239_s21   ;;  %s3695_s20 = sphi %s3778_s20, %s4238_s20   ;;  %s3691_s19 = sphi %s3776_s19, %s4237_s19   ;;  %s3687_s18 = sphi %s3774_s18, %s4236_s18   ;;  %s3683_s17 = sphi %s3772_s17, %s4235_s17  }
   0xc   : > { %4222 = sst [smem:[#allocation5_spill]] %s3699_s21  ;;  %s33_s25 = sadd.s32 1, %s3703_s22 }
   0xd   : > { %4223 = sst [smem:[#allocation6_spill]] %s3703_s22  ;;  %p31_p0 = scmp.ge.s32.totalorder %s30_s24, 4 }
   0xe   : > { %4224 = sst [smem:[#allocation7_spill]] %s3707_s23  ;;  %s40_s26 = sadd.s32 1, %s3687_s18 }
   0xf   : > { %p47_p1 = scmp.ne.s32.totalorder %s3687_s18, %s3683_s17  ;;  %p48_p2 = scmp.eq.s32.totalorder %s3707_s23, 0 }
  0x10   : > { %s4242_s24 = smov (%p31_p0, %s30_s24), 0  ;;  %s4244_s25 = smov (!%p31_p0, %s33_s25), %s3703_s22 }
  0x11   : > { %4225 = sst [smem:[#allocation8_spill]] %s4242_s24  ;;  %s37_s27 = ssub.s32 %s3699_s21, %s4242_s24 }
  0x12   : > { %p49_p3 = por %p48_p2, %p47_p1  ;;  %p35_p4 = scmp.ge.s32.totalorder %s4244_s25, 3 }
  0x13   : > { %p38_p5 = scmp.eq.s32.totalorder %s37_s27, 0  ;;  %p2925_p6 = scmp.ge.s32.totalorder %s3707_s23, 12 }
  0x14   : > { %s4246_s25 = smov (%p35_p4, %s4244_s25), 0 }
  0x15   : > { %4226 = sst [smem:[#allocation9_spill]] %s4246_s25  ;;  %359 = sbr.rel (%p2925_p6) target bundleno = 42 (0x2a), region = 20 }
  0x16   : > { %s3821_s28 = scalar_select %p38_p5, %s3687_s18, %s40_s26  }
  0x18   : > { %4227 = sst [smem:[#allocation10_spill]] %s3821_s28 }
  0x1c   : > { %362 = sbr.rel (!%p49_p3) target bundleno = 42 (0x2a), region = 24  ;;  %s364_s29 = sand.u32 (%p49_p3), 1, %s3687_s18  }
  0x1d   : > { %s3177_s30 = sshll.u32 (%p49_p3), %s3699_s21, 4  ;;  %s2926_s12 = sshll.u32 (%p49_p3), %s364_s29, 6 }
  0x1e   : > { %s4228_s0 = sld [smem:[#allocation11_spill]] (%p49_p3)  ;;  %s366_s16 = scalar_lea.vmem (%p49_p3), [#allocation3], %s2926_s12 }
  0x24   : > { %s369_s15 = scalar_lea.vmem %s4228_s0, %s3177_s30 }
  0x25   : > { %v382_v0 = vld [vmem:[%s369_s15] sm:$0xff]  ;;  %v384_v1 = vld [vmem:[%s369_s15 + $0x8] sm:$0xff] }
  0x26   : > { %v386_v2 = vld [vmem:[%s369_s15 + $0x40] sm:$0xff]  ;;  %383 = vst [vmem:[%s366_s16] sm:$0xff] %v382_v0  ;;  %385 = vst [vmem:[%s366_s16 + $0x8] sm:$0xff] %v384_v1  ;;  %v388_v3 = vld [vmem:[%s369_s15 + $0x48] sm:$0xff] }
  0x27   : > { %387 = vst [vmem:[%s366_s16 + $0x10] sm:$0xff] %v386_v2  ;;  %v390_v4 = vld [vmem:[%s369_s15 + $0x80] sm:$0xff]  ;;  %v392_v5 = vld [vmem:[%s369_s15 + $0x88] sm:$0xff]  ;;  %389 = vst [vmem:[%s366_s16 + $0x18] sm:$0xff] %v388_v3 }
  0x28   : > { %391 = vst [vmem:[%s366_s16 + $0x20] sm:$0xff] %v390_v4  ;;  %393 = vst [vmem:[%s366_s16 + $0x28] sm:$0xff] %v392_v5  ;;  %v394_v6 = vld [vmem:[%s369_s15 + $0xc0] sm:$0xff]  ;;  %v396_v7 = vld [vmem:[%s369_s15 + $0xc8] sm:$0xff] }
  0x29   : > { %395 = vst [vmem:[%s366_s16 + $0x30] sm:$0xff] %v394_v6  ;;  %397 = vst [vmem:[%s366_s16 + $0x38] sm:$0xff] %v396_v7 }
  0x2a PF: > { %p2929_p7 = scmp.ge.s32.totalorder %s3707_s23, 1  ;;  %p473_p8 = scmp.lt.s32.totalorder %s3707_s23, 13 }
  0x2c   : > { %p474_p9 = pnand %p2929_p7, %p473_p8 }
  0x2d   : > { %s480_s26 = sand.u32 (!%p474_p9), 1, %s3683_s17   ;;  %s2931_s27 = sshll.u32 (!%p474_p9), %s3691_s19, 6 }
  0x2e   : > { %477 = sbr.rel (%p474_p9) target bundleno = 1381 (0x565), region = 83  ;;  %s2930_s29 = sshll.u32 (!%p474_p9), %s480_s26, 6 }
  0x2f   : > { %p563_p10 = scmp.lt.s32.totalorder (!%p474_p9), %s3695_s20, 2  ;;  %p565_p11 = scmp.lt.s32.totalorder (!%p474_p9), %s2931_s27, 255 }
  0x30   : > { %s4229_s3 = sld [smem:[#allocation14_spill]] (!%p474_p9)  ;;  %s4230_s4 = sld [smem:[#allocation15_spill]] (!%p474_p9) }
  0x31   : > { %s4231_s2 = sld [smem:[#allocation13_spill]] (!%p474_p9)  ;;  %s4232_s5 = sld [smem:[#allocation16_spill]] (!%p474_p9) }
  0x32   : > { %p2945_p12 = scmp.ne.s32.totalorder (!%p474_p9), %s3691_s19, 0 }
  0x35   : > { %s4248_s20 = smov (!%p563_p10, %s3695_s20), 2  ;;  %s4250_s27 = smov (!%p565_p11, %s2931_s27), 255 }
  0x36   : > { %s2933_s30 = sshll.u32 %s4248_s20, 10  ;;  %s2935_s12 = sshll.u32 %s4248_s20, 2  ;;  %v3709_v8 = vmov (!%p2945_p12), 0.0  }
  0x37   : > { %s2932_s13 = sshll.u32 %s4250_s27, 2  ;;  %s3842_s15 = scalar_lea.vmem %s4229_s3, %s2935_s12  ;;  %615 = vst [vmem:[#allocation2] sm:$0xff] (!%p2945_p12), %v3709_v8  ;;  %616 = vst [vmem:[#allocation2 + $0x8] sm:$0xff] (!%p2945_p12), %v3709_v8 }
  0x38   : > { %s569_s16 = sadd.s32 %s2933_s30, %s2932_s13  ;;  %s3847_s25 = scalar_lea.vmem %s4230_s4, %s2935_s12  ;;  %617 = vst [vmem:[#allocation2 + $0x10] sm:$0xff] (!%p2945_p12), %v3709_v8  ;;  %618 = vst [vmem:[#allocation2 + $0x18] sm:$0xff] (!%p2945_p12), %v3709_v8 }
  0x39   : > { %s2934_s24 = sshll.u32 %s569_s16, 2  ;;  %s3178_s22 = sshll.u32 %s4248_s20, 9  ;;  %619 = vst [vmem:[#allocation2 + $0x20] sm:$0xff] (!%p2945_p12), %v3709_v8  ;;  %620 = vst [vmem:[#allocation2 + $0x28] sm:$0xff] (!%p2945_p12), %v3709_v8 }
  0x3a   : > { %s3853_s18 = scalar_lea.vmem %s4231_s2, %s2934_s24  ;;  %s3858_s1 = scalar_lea.vmem %s4232_s5, %s3178_s22  ;;  %621 = vst [vmem:[#allocation2 + $0x30] sm:$0xff] (!%p2945_p12), %v3709_v8  ;;  %622 = vst [vmem:[#allocation2 + $0x38] sm:$0xff] (!%p2945_p12), %v3709_v8 }
  0x3b   : > { %s2939_s14 = sshll.u32 %s4248_s20, 1  ;;  %s3179_s17 = sshll.u32 %s4248_s20, 7  ;;  %623 = vst [vmem:[#allocation2 + $0x40] sm:$0xff] (!%p2945_p12), %v3709_v8  ;;  %624 = vst [vmem:[#allocation2 + $0x48] sm:$0xff] (!%p2945_p12), %v3709_v8 }
  0x3c   : > { %s3865_s0 = scalar_lea.vmem %s4204_s6, %s2939_s14  ;;  %s3870_s26 = scalar_lea.vmem %s4205_s7, %s3179_s17  ;;  %625 = vst [vmem:[#allocation2 + $0x50] sm:$0xff] (!%p2945_p12), %v3709_v8  ;;  %626 = vst [vmem:[#allocation2 + $0x58] sm:$0xff] (!%p2945_p12), %v3709_v8 }
  0x3d   : > { %s597_s28 = scalar_lea.vmem %s4206_s8, %s4248_s20  ;;  %s3180_s2 = sshll.u32 %s4248_s20, 6  ;;  %627 = vst [vmem:[#allocation2 + $0x60] sm:$0xff] (!%p2945_p12), %v3709_v8  ;;  %628 = vst [vmem:[#allocation2 + $0x68] sm:$0xff] (!%p2945_p12), %v3709_v8 }
  0x3e   : > { %s3880_s27 = scalar_lea.vmem %s4207_s9, %s3180_s2  ;;  %s605_s30 = scalar_lea.vmem %s4208_s10, %s4248_s20  ;;  %629 = vst [vmem:[#allocation2 + $0x70] sm:$0xff] (!%p2945_p12), %v3709_v8  ;;  %630 = vst [vmem:[#allocation2 + $0x78] sm:$0xff] (!%p2945_p12), %v3709_v8 }
  0x3f   : > { %s3889_s12 = scalar_lea.vmem %s4209_s11, %s2939_s14  ;;  %s3891_s17 = scalar_lea.vmem [#allocation3], %s2930_s29 }
  0x40   : > { %614 = sbr.rel (%p2945_p12) target bundleno = 71 (0x47), region = 91 }
  0x47 PF: > { %v3329_v9 = vld [vmem:[%s3853_s18 + $0x4] ss:$16 sps:$4 sm:$0xff]   ;;  %v3331_v10 = vld [vmem:[%s3853_s18 + $0xc] ss:$16 sps:$4 sm:$0xff]   ;;  %v3333_v11 = vld [vmem:[%s3853_s18] ss:$16 sps:$4 sm:$0xff]  }
  0x48   : > { %1463 = vmatprep.subr.bf16.mxu0 %v3329_v9  ;;  %v3334_v12 = vld [vmem:[%s3853_s18 + $0x8] ss:$16 sps:$4 sm:$0xff]   ;;  %1569 = vmatprep.subr.bf16.mxu1 %v3331_v10  ;;  %v3335_v13 = vld [vmem:[%s3853_s18 + $0x24] ss:$16 sps:$4 sm:$0xff]   ;;  %v3337_v14 = vld [vmem:[%s3853_s18 + $0x2c] ss:$16 sps:$4 sm:$0xff]  }
  0x49   : > { %1464 = vmatpush1.bf16.msra.mxu0 %v3333_v11  ;;  %1570 = vmatpush1.bf16.msra.mxu1 %v3334_v12  ;;  %v3339_v15 = vld [vmem:[%s3853_s18 + $0x20] ss:$16 sps:$4 sm:$0xff]   ;;  %v3340_v16 = vld [vmem:[%s3853_s18 + $0x28] ss:$16 sps:$4 sm:$0xff]   ;;  %v3341_v17 = vld [vmem:[%s3853_s18 + $0x44] ss:$16 sps:$4 sm:$0xff]  }
  0x4a   : > { %1465 = vmatprep.subr.bf16.mxu0 %v3335_v13  ;;  %1571 = vmatprep.subr.bf16.mxu1 %v3337_v14  ;;  %v3343_v18 = vld [vmem:[%s3853_s18 + $0x4c] ss:$16 sps:$4 sm:$0xff]   ;;  %v3345_v19 = vld [vmem:[%s3853_s18 + $0x40] ss:$16 sps:$4 sm:$0xff]   ;;  %v3346_v20 = vld [vmem:[%s3853_s18 + $0x48] ss:$16 sps:$4 sm:$0xff]  }
  0x4b   : > { %v3347_v21 = vld [vmem:[%s3853_s18 + $0x64] ss:$16 sps:$4 sm:$0xff]   ;;  %v3349_v22 = vld [vmem:[%s3853_s18 + $0x6c] ss:$16 sps:$4 sm:$0xff]   ;;  %v3351_v23 = vld [vmem:[%s3853_s18 + $0x60] ss:$16 sps:$4 sm:$0xff]  }
  0x4c   : > { %v3352_v24 = vld [vmem:[%s3853_s18 + $0x68] ss:$16 sps:$4 sm:$0xff]   ;;  %v3353_v25 = vld [vmem:[%s3853_s18 + $0x84] ss:$16 sps:$4 sm:$0xff]   ;;  %v3355_v26 = vld [vmem:[%s3853_s18 + $0x8c] ss:$16 sps:$4 sm:$0xff]  }
  0x4d   : > { %1466 = vmatpush1.bf16.msra.mxu0 %v3339_v15  ;;  %1572 = vmatpush1.bf16.msra.mxu1 %v3340_v16  ;;  %v3357_v27 = vld [vmem:[%s3853_s18 + $0x80] ss:$16 sps:$4 sm:$0xff]   ;;  %v3358_v28 = vld [vmem:[%s3853_s18 + $0x88] ss:$16 sps:$4 sm:$0xff]   ;;  %v3359_v29 = vld [vmem:[%s3853_s18 + $0xa4] ss:$16 sps:$4 sm:$0xff]  }
  0x4e   : > { %1467 = vmatprep.subr.bf16.mxu0 %v3341_v17  ;;  %1573 = vmatprep.subr.bf16.mxu1 %v3343_v18  ;;  %v3361_v30 = vld [vmem:[%s3853_s18 + $0xac] ss:$16 sps:$4 sm:$0xff]   ;;  %v3363_v31 = vld [vmem:[%s3853_s18 + $0xa0] ss:$16 sps:$4 sm:$0xff]   ;;  %v3364_v32 = vld [vmem:[%s3853_s18 + $0xa8] ss:$16 sps:$4 sm:$0xff]  }
  0x4f   : > { %v3365_v33 = vld [vmem:[%s3853_s18 + $0xc4] ss:$16 sps:$4 sm:$0xff]   ;;  %v3367_v34 = vld [vmem:[%s3853_s18 + $0xcc] ss:$16 sps:$4 sm:$0xff]   ;;  %v3369_v35 = vld [vmem:[%s3853_s18 + $0xc0] ss:$16 sps:$4 sm:$0xff]  }
  0x50   : > { %v3370_v36 = vld [vmem:[%s3853_s18 + $0xc8] ss:$16 sps:$4 sm:$0xff]   ;;  %v3371_v37 = vld [vmem:[%s3853_s18 + $0xe4] ss:$16 sps:$4 sm:$0xff]   ;;  %v3373_v38 = vld [vmem:[%s3853_s18 + $0xec] ss:$16 sps:$4 sm:$0xff]  }
  0x51   : > { %1468 = vmatpush1.bf16.msra.mxu0 %v3345_v19  ;;  %1574 = vmatpush1.bf16.msra.mxu1 %v3346_v20  ;;  %v3375_v39 = vld [vmem:[%s3853_s18 + $0xe0] ss:$16 sps:$4 sm:$0xff]   ;;  %v3376_v40 = vld [vmem:[%s3853_s18 + $0xe8] ss:$16 sps:$4 sm:$0xff]   ;;  %v3377_v41 = vld [vmem:[%s3853_s18 + $0x104] ss:$16 sps:$4 sm:$0xff]  }
  0x52   : > { %1469 = vmatprep.subr.bf16.mxu0 %v3347_v21  ;;  %1575 = vmatprep.subr.bf16.mxu1 %v3349_v22  ;;  %v3379_v42 = vld [vmem:[%s3853_s18 + $0x10c] ss:$16 sps:$4 sm:$0xff]   ;;  %v3381_v43 = vld [vmem:[%s3853_s18 + $0x100] ss:$16 sps:$4 sm:$0xff]   ;;  %v3382_v44 = vld [vmem:[%s3853_s18 + $0x108] ss:$16 sps:$4 sm:$0xff]  }
  0x53   : > { %v3383_v45 = vld [vmem:[%s3853_s18 + $0x124] ss:$16 sps:$4 sm:$0xff]   ;;  %v3385_v46 = vld [vmem:[%s3853_s18 + $0x12c] ss:$16 sps:$4 sm:$0xff]   ;;  %v3387_v47 = vld [vmem:[%s3853_s18 + $0x120] ss:$16 sps:$4 sm:$0xff]  }
  0x54   : > { %v3388_v48 = vld [vmem:[%s3853_s18 + $0x128] ss:$16 sps:$4 sm:$0xff]   ;;  %v3389_v49 = vld [vmem:[%s3853_s18 + $0x144] ss:$16 sps:$4 sm:$0xff]   ;;  %v3391_v50 = vld [vmem:[%s3853_s18 + $0x14c] ss:$16 sps:$4 sm:$0xff]  }
  0x55   : > { %1470 = vmatpush1.bf16.msra.mxu0 %v3351_v23  ;;  %1576 = vmatpush1.bf16.msra.mxu1 %v3352_v24  ;;  %v3393_v51 = vld [vmem:[%s3853_s18 + $0x140] ss:$16 sps:$4 sm:$0xff]   ;;  %v3394_v52 = vld [vmem:[%s3853_s18 + $0x148] ss:$16 sps:$4 sm:$0xff]   ;;  %v3395_v53 = vld [vmem:[%s3853_s18 + $0x164] ss:$16 sps:$4 sm:$0xff]  }
  0x56   : > { %1471 = vmatprep.subr.bf16.mxu0 %v3353_v25  ;;  %1577 = vmatprep.subr.bf16.mxu1 %v3355_v26  ;;  %v3397_v54 = vld [vmem:[%s3853_s18 + $0x16c] ss:$16 sps:$4 sm:$0xff]   ;;  %v3399_v55 = vld [vmem:[%s3853_s18 + $0x160] ss:$16 sps:$4 sm:$0xff]   ;;  %v3400_v56 = vld [vmem:[%s3853_s18 + $0x168] ss:$16 sps:$4 sm:$0xff]  }
  0x57   : > { %v3427_v57 = vld [vmem:[%s3891_s17 + $0x4] ss:$16 sps:$4 sm:$0xff]   ;;  %v3403_v59 = vld [vmem:[%s3853_s18 + $0x18c] ss:$16 sps:$4 sm:$0xff]   ;;  %v3405_v60 = vld [vmem:[%s3853_s18 + $0x180] ss:$16 sps:$4 sm:$0xff]  }
  0x58   : > { %v3401_v58 = vld [vmem:[%s3853_s18 + $0x184] ss:$16 sps:$4 sm:$0xff]   ;;  %1495 = vmatprep.mubr.bf16.mxu0 %v3427_v57  ;;  %1601 = vmatprep.mubr.bf16.mxu1 %v3427_v57  ;;  %v3406_v61 = vld [vmem:[%s3853_s18 + $0x188] ss:$16 sps:$4 sm:$0xff]   ;;  %v3409_v63 = vld [vmem:[%s3853_s18 + $0x1ac] ss:$16 sps:$4 sm:$0xff]  }
  0x59   : > { %1472 = vmatpush1.bf16.msra.mxu0 %v3357_v27  ;;  %1578 = vmatpush1.bf16.msra.mxu1 %v3358_v28  ;;  %v3407_v62 = vld [vmem:[%s3853_s18 + $0x1a4] ss:$16 sps:$4 sm:$0xff]   ;;  %v3411_v0 = vld [vmem:[%s3853_s18 + $0x1a0] ss:$16 sps:$4 sm:$0xff]   ;;  %v3412_v1 = vld [vmem:[%s3853_s18 + $0x1a8] ss:$16 sps:$4 sm:$0xff]  }
  0x5a   : > { %1473 = vmatprep.subr.bf16.mxu0 %v3359_v29  ;;  %1579 = vmatprep.subr.bf16.mxu1 %v3361_v30  ;;  %v3413_v2 = vld [vmem:[%s3853_s18 + $0x1c4] ss:$16 sps:$4 sm:$0xff]   ;;  %v3415_v3 = vld [vmem:[%s3853_s18 + $0x1cc] ss:$16 sps:$4 sm:$0xff]   ;;  %v3417_v4 = vld [vmem:[%s3853_s18 + $0x1c0] ss:$16 sps:$4 sm:$0xff]  }
  0x5b   : > { %v3418_v5 = vld [vmem:[%s3853_s18 + $0x1c8] ss:$16 sps:$4 sm:$0xff]   ;;  %v3419_v6 = vld [vmem:[%s3853_s18 + $0x1e4] ss:$16 sps:$4 sm:$0xff]   ;;  %v3421_v7 = vld [vmem:[%s3853_s18 + $0x1ec] ss:$16 sps:$4 sm:$0xff]  }
  0x5c   : > { %v3423_v8 = vld [vmem:[%s3853_s18 + $0x1e0] ss:$16 sps:$4 sm:$0xff]   ;;  %v3424_v9 = vld [vmem:[%s3853_s18 + $0x1e8] ss:$16 sps:$4 sm:$0xff]   ;;  %v3430_v10 = vld [vmem:[%s3853_s18 + $0x204] ss:$16 sps:$4 sm:$0xff]  }
  0x5d   : > { %1474 = vmatpush1.bf16.msra.mxu0 %v3363_v31  ;;  %1580 = vmatpush1.bf16.msra.mxu1 %v3364_v32  ;;  %v3433_v11 = vld [vmem:[%s3853_s18 + $0x20c] ss:$16 sps:$4 sm:$0xff]   ;;  %v3425_v12 = vld [vmem:[%s3891_s17] ss:$16 sps:$4 sm:$0xff]   ;;  %v3431_v14 = vld [vmem:[%s3853_s18 + $0x208] ss:$16 sps:$4 sm:$0xff]  }
  0x5e   : > { %1475 = vmatprep.subr.bf16.mxu0 %v3365_v33  ;;  %1581 = vmatprep.subr.bf16.mxu1 %v3367_v34  ;;  %v3428_v13 = vld [vmem:[%s3853_s18 + $0x200] ss:$16 sps:$4 sm:$0xff]   ;;  %v3436_v15 = vld [vmem:[%s3853_s18 + $0x224] ss:$16 sps:$4 sm:$0xff]   ;;  %v3439_v16 = vld [vmem:[%s3853_s18 + $0x22c] ss:$16 sps:$4 sm:$0xff]  }
  0x5f   : > { %v3434_v17 = vld [vmem:[%s3853_s18 + $0x220] ss:$16 sps:$4 sm:$0xff]   ;;  %v3437_v18 = vld [vmem:[%s3853_s18 + $0x228] ss:$16 sps:$4 sm:$0xff]   ;;  %v3442_v19 = vld [vmem:[%s3853_s18 + $0x244] ss:$16 sps:$4 sm:$0xff]  }
  0x60   : > { %v3445_v20 = vld [vmem:[%s3853_s18 + $0x24c] ss:$16 sps:$4 sm:$0xff]   ;;  %v3440_v21 = vld [vmem:[%s3853_s18 + $0x240] ss:$16 sps:$4 sm:$0xff]   ;;  %v3443_v22 = vld [vmem:[%s3853_s18 + $0x248] ss:$16 sps:$4 sm:$0xff]  }
  0x61   : > { %1476 = vmatpush1.bf16.msra.mxu0 %v3369_v35  ;;  %1582 = vmatpush1.bf16.msra.mxu1 %v3370_v36  ;;  %v3448_v23 = vld [vmem:[%s3853_s18 + $0x264] ss:$16 sps:$4 sm:$0xff]   ;;  %v3451_v24 = vld [vmem:[%s3853_s18 + $0x26c] ss:$16 sps:$4 sm:$0xff]   ;;  %v3446_v25 = vld [vmem:[%s3853_s18 + $0x260] ss:$16 sps:$4 sm:$0xff]  }
  0x62   : > { %1477 = vmatprep.subr.bf16.mxu0 %v3371_v37  ;;  %1583 = vmatprep.subr.bf16.mxu1 %v3373_v38  ;;  %v3449_v26 = vld [vmem:[%s3853_s18 + $0x268] ss:$16 sps:$4 sm:$0xff]   ;;  %v3454_v27 = vld [vmem:[%s3853_s18 + $0x284] ss:$16 sps:$4 sm:$0xff]   ;;  %v3457_v28 = vld [vmem:[%s3853_s18 + $0x28c] ss:$16 sps:$4 sm:$0xff]  }
  0x63   : > { %v3452_v29 = vld [vmem:[%s3853_s18 + $0x280] ss:$16 sps:$4 sm:$0xff]   ;;  %v3455_v30 = vld [vmem:[%s3853_s18 + $0x288] ss:$16 sps:$4 sm:$0xff]   ;;  %v3460_v31 = vld [vmem:[%s3853_s18 + $0x2a4] ss:$16 sps:$4 sm:$0xff]  }
  0x64   : > { %v3463_v32 = vld [vmem:[%s3853_s18 + $0x2ac] ss:$16 sps:$4 sm:$0xff]   ;;  %v3458_v33 = vld [vmem:[%s3853_s18 + $0x2a0] ss:$16 sps:$4 sm:$0xff]   ;;  %v3512_v34 = vld [vmem:[%s3891_s17 + $0x24] ss:$16 sps:$4 sm:$0xff]  }
  0x65   : > { %1478 = vmatpush1.bf16.msra.mxu0 %v3375_v39  ;;  %1584 = vmatpush1.bf16.msra.mxu1 %v3376_v40  ;;  %v3461_v35 = vld [vmem:[%s3853_s18 + $0x2a8] ss:$16 sps:$4 sm:$0xff]   ;;  %v3514_v36 = vld [vmem:[%s3891_s17 + $0x20] ss:$16 sps:$4 sm:$0xff]   ;;  %v3466_v37 = vld [vmem:[%s3853_s18 + $0x2c4] ss:$16 sps:$4 sm:$0xff]  }
  0x66   : > { %1479 = vmatprep.subr.bf16.mxu0 %v3377_v41  ;;  %1585 = vmatprep.subr.bf16.mxu1 %v3379_v42  ;;  %v3469_v38 = vld [vmem:[%s3853_s18 + $0x2cc] ss:$16 sps:$4 sm:$0xff]   ;;  %v3464_v39 = vld [vmem:[%s3853_s18 + $0x2c0] ss:$16 sps:$4 sm:$0xff]   ;;  %v3467_v40 = vld [vmem:[%s3853_s18 + $0x2c8] ss:$16 sps:$4 sm:$0xff]  }
  0x67   : > { %v3472_v41 = vld [vmem:[%s3853_s18 + $0x2e4] ss:$16 sps:$4 sm:$0xff]   ;;  %v3475_v42 = vld [vmem:[%s3853_s18 + $0x2ec] ss:$16 sps:$4 sm:$0xff]   ;;  %v3491_v57 = vld [vmem:[%s3853_s18 + $0x348] ss:$16 sps:$4 sm:$0xff]  }
  0x68   : > { %p3082_p13 = scmp.ne.s32.totalorder %s3691_s19, 3 }
  0x69   : > { %1480 = vmatpush1.bf16.msra.mxu0 %v3381_v43  ;;  %1586 = vmatpush1.bf16.msra.mxu1 %v3382_v44  ;;  %v3529_v43 = vld [vmem:[%s3891_s17 + $0xc] ss:$16 sps:$4 sm:$0xff]   ;;  %v3470_v44 = vld [vmem:[%s3853_s18 + $0x2e0] ss:$16 sps:$4 sm:$0xff]   ;;  %vm1820_vm0 = vcmask (!%p3082_p13), 261120   ;;  %s4233_s4 = sld [smem:[#allocation12_spill]] (!%p3082_p13) }
  0x6a   : > { %1481 = vmatprep.subr.bf16.mxu0 %v3383_v45  ;;  %1587 = vmatprep.subr.bf16.mxu1 %v3385_v46  ;;  %v3473_v45 = vld [vmem:[%s3853_s18 + $0x2e8] ss:$16 sps:$4 sm:$0xff]   ;;  %v3478_v46 = vld [vmem:[%s3853_s18 + $0x304] ss:$16 sps:$4 sm:$0xff]   ;;  %vm3711_vm1 = vmmov (!%p3082_p13), 0  }
  0x6d   : > { %1482 = vmatpush1.bf16.msra.mxu0 %v3387_v47  ;;  %1588 = vmatpush1.bf16.msra.mxu1 %v3388_v48  ;;  %v3481_v47 = vld [vmem:[%s3853_s18 + $0x30c] ss:$16 sps:$4 sm:$0xff]   ;;  %v3476_v48 = vld [vmem:[%s3853_s18 + $0x300] ss:$16 sps:$4 sm:$0xff]  }
  0x6e   : > { %1483 = vmatprep.subr.bf16.mxu0 %v3389_v49  ;;  %1589 = vmatprep.subr.bf16.mxu1 %v3391_v50  ;;  %v3479_v49 = vld [vmem:[%s3853_s18 + $0x308] ss:$16 sps:$4 sm:$0xff]   ;;  %v3484_v50 = vld [vmem:[%s3853_s18 + $0x324] ss:$16 sps:$4 sm:$0xff]  }
  0x71   : > { %1484 = vmatpush1.bf16.msra.mxu0 %v3393_v51  ;;  %1590 = vmatpush1.bf16.msra.mxu1 %v3394_v52  ;;  %v3487_v51 = vld [vmem:[%s3853_s18 + $0x32c] ss:$16 sps:$4 sm:$0xff]   ;;  %v3482_v52 = vld [vmem:[%s3853_s18 + $0x320] ss:$16 sps:$4 sm:$0xff]  }
  0x72   : > { %1485 = vmatprep.subr.bf16.mxu0 %v3395_v53  ;;  %1591 = vmatprep.subr.bf16.mxu1 %v3397_v54  ;;  %v3485_v53 = vld [vmem:[%s3853_s18 + $0x328] ss:$16 sps:$4 sm:$0xff]   ;;  %v3490_v54 = vld [vmem:[%s3853_s18 + $0x344] ss:$16 sps:$4 sm:$0xff]  }
  0x75   : > { %1486 = vmatpush1.bf16.msra.mxu0 %v3399_v55  ;;  %1592 = vmatpush1.bf16.msra.mxu1 %v3400_v56  ;;  %v3493_v55 = vld [vmem:[%s3853_s18 + $0x34c] ss:$16 sps:$4 sm:$0xff]   ;;  %v3488_v56 = vld [vmem:[%s3853_s18 + $0x340] ss:$16 sps:$4 sm:$0xff]  }
  0x76   : > { %1487 = vmatprep.subr.bf16.mxu0 %v3401_v58  ;;  %1593 = vmatprep.subr.bf16.mxu1 %v3403_v59  ;;  %v3496_v58 = vld [vmem:[%s3853_s18 + $0x364] ss:$16 sps:$4 sm:$0xff]   ;;  %v3499_v59 = vld [vmem:[%s3853_s18 + $0x36c] ss:$16 sps:$4 sm:$0xff]  }
  0x79   : > { %1488 = vmatpush1.bf16.msra.mxu0 %v3405_v60  ;;  %1594 = vmatpush1.bf16.msra.mxu1 %v3406_v61  ;;  %v3494_v60 = vld [vmem:[%s3853_s18 + $0x360] ss:$16 sps:$4 sm:$0xff]   ;;  %v3497_v61 = vld [vmem:[%s3853_s18 + $0x368] ss:$16 sps:$4 sm:$0xff]  }
  0x7a   : > { %1489 = vmatprep.subr.bf16.mxu0 %v3407_v62  ;;  %1595 = vmatprep.subr.bf16.mxu1 %v3409_v63  ;;  %v3502_v62 = vld [vmem:[%s3853_s18 + $0x384] ss:$16 sps:$4 sm:$0xff]   ;;  %v3505_v63 = vld [vmem:[%s3853_s18 + $0x38c] ss:$16 sps:$4 sm:$0xff]  }
  0x7d   : > { %1490 = vmatpush1.bf16.msra.mxu0 %v3411_v0  ;;  %1596 = vmatpush1.bf16.msra.mxu1 %v3412_v1  ;;  %v3500_v0 = vld [vmem:[%s3853_s18 + $0x380] ss:$16 sps:$4 sm:$0xff]   ;;  %v3503_v1 = vld [vmem:[%s3853_s18 + $0x388] ss:$16 sps:$4 sm:$0xff]  }
  0x7e   : > { %1491 = vmatprep.subr.bf16.mxu0 %v3413_v2  ;;  %1597 = vmatprep.subr.bf16.mxu1 %v3415_v3  ;;  %v3508_v2 = vld [vmem:[%s3853_s18 + $0x3a4] ss:$16 sps:$4 sm:$0xff]   ;;  %v3511_v3 = vld [vmem:[%s3853_s18 + $0x3ac] ss:$16 sps:$4 sm:$0xff]  }
  0x81   : > { %1492 = vmatpush1.bf16.msra.mxu0 %v3417_v4  ;;  %1598 = vmatpush1.bf16.msra.mxu1 %v3418_v5  ;;  %v3506_v4 = vld [vmem:[%s3853_s18 + $0x3a0] ss:$16 sps:$4 sm:$0xff]   ;;  %v3509_v5 = vld [vmem:[%s3853_s18 + $0x3a8] ss:$16 sps:$4 sm:$0xff]  }
  0x82   : > { %1493 = vmatprep.subr.bf16.mxu0 %v3419_v6  ;;  %1599 = vmatprep.subr.bf16.mxu1 %v3421_v7  ;;  %v3517_v6 = vld [vmem:[%s3853_s18 + $0x3c4] ss:$16 sps:$4 sm:$0xff]   ;;  %v3520_v7 = vld [vmem:[%s3853_s18 + $0x3cc] ss:$16 sps:$4 sm:$0xff]  }
  0x85   : > { %1494 = vmatpush1.bf16.msra.mxu0 %v3423_v8  ;;  %1600 = vmatpush1.bf16.msra.mxu1 %v3424_v9  ;;  %v3515_v8 = vld [vmem:[%s3853_s18 + $0x3c0] ss:$16 sps:$4 sm:$0xff]   ;;  %v3518_v9 = vld [vmem:[%s3853_s18 + $0x3c8] ss:$16 sps:$4 sm:$0xff]  }
  0x86   : > { %1516 = vmatprep.subr.bf16.mxu0 %v3430_v10  ;;  %1622 = vmatprep.subr.bf16.mxu1 %v3433_v11  ;;  %v3523_v10 = vld [vmem:[%s3853_s18 + $0x3e4] ss:$16 sps:$4 sm:$0xff]   ;;  %v3526_v11 = vld [vmem:[%s3853_s18 + $0x3ec] ss:$16 sps:$4 sm:$0xff]  }
  0x88   : > { %1496 = vmatmul.mubr.bf16.vlgmr.msra.gmra.mrb[0].mxu0 %v3425_v12  ;;  %1602 = vmatmul.mubr.bf16.vlgmr.msra.gmra.mrb[0].mxu1 %v3425_v12  ;;  %v3521_v12 = vld [vmem:[%s3853_s18 + $0x3e0] ss:$16 sps:$4 sm:$0xff]  }
  0x89   : > { %1517 = vmatpush1.bf16.msra.mxu0 %v3428_v13  ;;  %1623 = vmatpush1.bf16.msra.mxu1 %v3431_v14  ;;  %v3524_v13 = vld [vmem:[%s3853_s18 + $0x3e8] ss:$16 sps:$4 sm:$0xff]  }
  0x8a   : > { %1518 = vmatprep.subr.bf16.mxu0 %v3436_v15  ;;  %1624 = vmatprep.subr.bf16.mxu1 %v3439_v16  ;;  %v3527_v14 = vld [vmem:[%s3891_s17 + $0x8] ss:$16 sps:$4 sm:$0xff]   ;;  %v3530_v15 = vld [vmem:[%s3891_s17 + $0x2c] ss:$16 sps:$4 sm:$0xff]  }
  0x8b   : > { %1505 = vmatprep.mubr.bf16.mxu0 %v3512_v34  ;;  %1611 = vmatprep.mubr.bf16.mxu1 %v3512_v34  ;;  %v3532_v16 = vld [vmem:[%s3891_s17 + $0x28] ss:$16 sps:$4 sm:$0xff]  }
  0x8d   : > { %1519 = vmatpush1.bf16.msra.mxu0 %v3434_v17  ;;  %1625 = vmatpush1.bf16.msra.mxu1 %v3437_v18  ;;  %v631_v17 = vld [vmem:[#allocation2] sm:$0xff]  ;;  %v633_v18 = vld [vmem:[#allocation2 + $0x10] sm:$0xff] }
  0x8e   : > { %1520 = vmatprep.subr.bf16.mxu0 %v3442_v19  ;;  %1626 = vmatprep.subr.bf16.mxu1 %v3445_v20  ;;  %v632_v19 = vld [vmem:[#allocation2 + $0x8] sm:$0xff]  ;;  %v634_v20 = vld [vmem:[#allocation2 + $0x18] sm:$0xff] }
  0x90   : > { %1506 = vmatmul.mubr.bf16.gmra.mrb[4].mxu0 %v3514_v36  ;;  %1612 = vmatmul.mubr.bf16.gmra.mrb[4].mxu1 %v3514_v36 }
  0x91   : > { %1521 = vmatpush1.bf16.msra.mxu0 %v3440_v21  ;;  %1627 = vmatpush1.bf16.msra.mxu1 %v3443_v22 }
  0x92   : > { %1522 = vmatprep.subr.bf16.mxu0 %v3448_v23  ;;  %1628 = vmatprep.subr.bf16.mxu1 %v3451_v24  ;;  %v635_v23 = vld [vmem:[#allocation2 + $0x20] sm:$0xff]  ;;  %v637_v24 = vld [vmem:[#allocation2 + $0x30] sm:$0xff] }
  0x93   : > { %1548 = vmatprep.mubr.bf16.mxu0 %v3529_v43  ;;  %1654 = vmatprep.mubr.bf16.mxu1 %v3529_v43  ;;  %v640_v43 = vld [vmem:[#allocation2 + $0x48] sm:$0xff] }
  0x95   : > { %1523 = vmatpush1.bf16.msra.mxu0 %v3446_v25  ;;  %1629 = vmatpush1.bf16.msra.mxu1 %v3449_v26 }
  0x96   : > { %1524 = vmatprep.subr.bf16.mxu0 %v3454_v27  ;;  %1630 = vmatprep.subr.bf16.mxu1 %v3457_v28 }
  0x99   : > { %1525 = vmatpush1.bf16.msra.mxu0 %v3452_v29  ;;  %1631 = vmatpush1.bf16.msra.mxu1 %v3455_v30  ;;  %v636_v29 = vld [vmem:[#allocation2 + $0x28] sm:$0xff]  ;;  %v638_v30 = vld [vmem:[#allocation2 + $0x38] sm:$0xff] }
  0x9a   : > { %1526 = vmatprep.subr.bf16.mxu0 %v3460_v31  ;;  %1632 = vmatprep.subr.bf16.mxu1 %v3463_v32 }
  0x9d   : > { %1527 = vmatpush1.bf16.msra.mxu0 %v3458_v33  ;;  %1633 = vmatpush1.bf16.msra.mxu1 %v3461_v35 }
  0x9e   : > { %1528 = vmatprep.subr.bf16.mxu0 %v3466_v37  ;;  %1634 = vmatprep.subr.bf16.mxu1 %v3469_v38 }
  0xa1   : > { %1529 = vmatpush1.bf16.msra.mxu0 %v3464_v39  ;;  %1635 = vmatpush1.bf16.msra.mxu1 %v3467_v40 }
  0xa2   : > { %1530 = vmatprep.subr.bf16.mxu0 %v3472_v41  ;;  %1636 = vmatprep.subr.bf16.mxu1 %v3475_v42  ;;  %v639_v41 = vld [vmem:[#allocation2 + $0x40] sm:$0xff]  ;;  %v641_v42 = vld [vmem:[#allocation2 + $0x50] sm:$0xff] }
  0xa5   : > { %1531 = vmatpush1.bf16.msra.mxu0 %v3470_v44  ;;  %1637 = vmatpush1.bf16.msra.mxu1 %v3473_v45  ;;  %v642_v44 = vld [vmem:[#allocation2 + $0x58] sm:$0xff] }
  0xa6   : > { %1532 = vmatprep.subr.bf16.mxu0 %v3478_v46  ;;  %1638 = vmatprep.subr.bf16.mxu1 %v3481_v47  ;;  %v643_v47 = vld [vmem:[#allocation2 + $0x60] sm:$0xff] }
  0xa9   : > { %1533 = vmatpush1.bf16.msra.mxu0 %v3476_v48  ;;  %1639 = vmatpush1.bf16.msra.mxu1 %v3479_v49  ;;  %v645_v48 = vld [vmem:[#allocation2 + $0x70] sm:$0xff] }
  0xaa   : > { %1534 = vmatprep.subr.bf16.mxu0 %v3484_v50  ;;  %1640 = vmatprep.subr.bf16.mxu1 %v3487_v51 }
  0xad   : > { %1535 = vmatpush1.bf16.msra.mxu0 %v3482_v52  ;;  %1641 = vmatpush1.bf16.msra.mxu1 %v3485_v53  ;;  %v644_v53 = vld [vmem:[#allocation2 + $0x68] sm:$0xff] }
  0xae   : > { %1536 = vmatprep.subr.bf16.mxu0 %v3490_v54  ;;  %1642 = vmatprep.subr.bf16.mxu1 %v3493_v55  ;;  %v646_v54 = vld [vmem:[#allocation2 + $0x78] sm:$0xff] }
  0xb1   : > { %1537 = vmatpush1.bf16.msra.mxu0 %v3488_v56  ;;  %1643 = vmatpush1.bf16.msra.mxu1 %v3491_v57 }
  0xb2   : > { %1538 = vmatprep.subr.bf16.mxu0 %v3496_v58  ;;  %1644 = vmatprep.subr.bf16.mxu1 %v3499_v59 }
  0xb5   : > { %1539 = vmatpush1.bf16.msra.mxu0 %v3494_v60  ;;  %1645 = vmatpush1.bf16.msra.mxu1 %v3497_v61 }
  0xb6   : > { %1540 = vmatprep.subr.bf16.mxu0 %v3502_v62  ;;  %1646 = vmatprep.subr.bf16.mxu1 %v3505_v63 }
  0xb9   : > { %1541 = vmatpush1.bf16.msra.mxu0 %v3500_v0  ;;  %1647 = vmatpush1.bf16.msra.mxu1 %v3503_v1  ;;  %v1729_v1 = vlaneseq (!%p3082_p13) }
  0xba   : > { %1542 = vmatprep.subr.bf16.mxu0 %v3508_v2  ;;  %1648 = vmatprep.subr.bf16.mxu1 %v3511_v3  ;;  %v3710_v2 = vmov (!%p3082_p13), 0.0  }
  0xbb   : > { %v1730_v3 = vshrl.u32 (!%p3082_p13), %v1729_v1, 7 }
  0xbd   : > { %1543 = vmatpush1.bf16.msra.mxu0 %v3506_v4  ;;  %1649 = vmatpush1.bf16.msra.mxu1 %v3509_v5  ;;  %v1727_v5 = vld [vmem:[%s3842_s15] sm:$0xf] (!%p3082_p13) }
  0xbe   : > { %1544 = vmatprep.subr.bf16.mxu0 %v3517_v6  ;;  %1650 = vmatprep.subr.bf16.mxu1 %v3520_v7  ;;  %v1765_v6 = vld [vmem:[%s3847_s25] sm:$0xf] (!%p3082_p13) }
  0xc1   : > { %1545 = vmatpush1.bf16.msra.mxu0 %v3515_v8  ;;  %1651 = vmatpush1.bf16.msra.mxu1 %v3518_v9  ;;  %v4034_v8 = vsub.s32 (!%p3082_p13), 1, %v1730_v3 }
  0xc2   : > { %1546 = vmatprep.subr.bf16.mxu0 %v3523_v10  ;;  %1652 = vmatprep.subr.bf16.mxu1 %v3526_v11  ;;  %v4036_v11 = vsub.s32 (!%p3082_p13), 0, %v1730_v3 }
  0xc5   : > { %1547 = vmatpush1.bf16.msra.mxu0 %v3521_v12  ;;  %1653 = vmatpush1.bf16.msra.mxu1 %v3524_v13  ;;  %v1743_v12 = vsub.s32 (!%p3082_p13), 3, %v1730_v3 }
  0xc8   : > { %1549 = vmatmul.mubr.bf16.vlgmr.msra.gmra.mrb[0].mxu0 %v3527_v14  ;;  %1655 = vmatmul.mubr.bf16.vlgmr.msra.gmra.mrb[0].mxu1 %v3527_v14 }
  0xc9   : > { %1558 = vmatprep.mubr.bf16.mxu0 %v3530_v15  ;;  %1664 = vmatprep.mubr.bf16.mxu1 %v3530_v15 }
  0xd0   : > { %1559 = vmatmul.mubr.bf16.gmra.mrb[4].mxu0 %v3532_v16  ;;  %1665 = vmatmul.mubr.bf16.gmra.mrb[4].mxu1 %v3532_v16  ;;  %v1739_v16 = vsub.s32 (!%p3082_p13), 2, %v1730_v3 }
  0xd1   : > { %1888 = vmatprep.mubr.f32.mxu1 (!%p3082_p13), %v3710_v2 }
 0x19b   : > { %v1550_v21 = vpop.f32.mrb[0].mxu0  ;;  %v1656_v22 = vpop.f32.mrb[0].mxu1 }
 0x19c   : > { %v1675_v25 = vadd.f32 %v1550_v21, %v631_v17  ;;  %v1677_v26 = vadd.f32 %v1656_v22, %v633_v18  ;;  %v1552_v27 = vpop.f32.mrb[1].mxu0  ;;  %v1658_v28 = vpop.f32.mrb[1].mxu1  ;;  %v1736_v17 = vrot.slane (!%p3082_p13), %v1727_v5, %v4034_v8  ;;  %v1774_v18 = vrot.slane (!%p3082_p13), %v1765_v6, %v4034_v8 }
 0x19d   : > { %v1676_v31 = vadd.f32 %v1552_v27, %v632_v19  ;;  %v1678_v32 = vadd.f32 %v1658_v28, %v634_v20  ;;  %v1554_v33 = vpop.f32.mrb[2].mxu0  ;;  %v1660_v34 = vpop.f32.mrb[2].mxu1  ;;  %v1732_v19 = vrot.slane (!%p3082_p13), %v1727_v5, %v4036_v11  ;;  %v1770_v20 = vrot.slane (!%p3082_p13), %v1765_v6, %v4036_v11  ;;  %v3535_v27 = vld [vmem:[%s3858_s1] ss:$8 sps:$4 sm:$0xff] (!%p3082_p13)  }
 0x19e   : > { %1691 = vst [vmem:[#allocation2] sm:$0xff] %v1675_v25  ;;  %1693 = vst [vmem:[#allocation2 + $0x10] sm:$0xff] %v1677_v26  ;;  %v1679_v35 = vadd.f32 %v1554_v33, %v635_v23  ;;  %v1681_v36 = vadd.f32 %v1660_v34, %v637_v24  ;;  %v1556_v37 = vpop.f32.mrb[3].mxu0  ;;  %v1662_v38 = vpop.f32.mrb[3].mxu1  ;;  %v1744_v22 = vrot.slane (!%p3082_p13), %v1727_v5, %v1743_v12  ;;  %v3533_v26 = vld [vmem:[%s3858_s1 + $0x4] ss:$8 sps:$4 sm:$0xff] (!%p3082_p13)  }
 0x19f   : > { %1692 = vst [vmem:[#allocation2 + $0x8] sm:$0xff] %v1676_v31  ;;  %1694 = vst [vmem:[#allocation2 + $0x18] sm:$0xff] %v1678_v32  ;;  %v1680_v39 = vadd.f32 %v1556_v37, %v636_v29  ;;  %v1682_v40 = vadd.f32 %v1662_v38, %v638_v30  ;;  %v4042_v23 = vrot.slane (!%p3082_p13), %v1765_v6, %v1743_v12  ;;  %v3536_v32 = vld [vmem:[%s3858_s1 + $0x14] ss:$8 sps:$4 sm:$0xff] (!%p3082_p13)   ;;  %2366 = vmatprep.subr.bf16.mxu0 (!%p3082_p13), %v3533_v26 }
 0x1a0   : > { %1695 = vst [vmem:[#allocation2 + $0x20] sm:$0xff] %v1679_v35  ;;  %1697 = vst [vmem:[#allocation2 + $0x30] sm:$0xff] %v1681_v36  ;;  %v4044_v24 = vrot.slane (!%p3082_p13), %v1727_v5, %v1739_v16  ;;  %v4046_v25 = vrot.slane (!%p3082_p13), %v1765_v6, %v1739_v16  ;;  %2367 = vmatpush1.bf16.msra.mxu0 (!%p3082_p13), %v3535_v27 }
 0x1a1   : > { %1696 = vst [vmem:[#allocation2 + $0x28] sm:$0xff] %v1680_v39  ;;  %1698 = vst [vmem:[#allocation2 + $0x38] sm:$0xff] %v1682_v40  ;;  %2368 = vmatprep.subr.bf16.mxu0 (!%p3082_p13), %v3536_v32  ;;  %v3545_v32 = vld [vmem:[%s3858_s1 + $0x44] ss:$8 sps:$4 sm:$0xff] (!%p3082_p13)  }
 0x1a3   : > { %v1560_v45 = vpop.f32.mrb[4].mxu0  ;;  %v1666_v46 = vpop.f32.mrb[4].mxu1  ;;  %1710 = sbr.rel (%p3082_p13) target bundleno = 1381 (0x565), region = 95 }
 0x1a4   : > { %v1683_v49 = vadd.f32 %v1560_v45, %v639_v41  ;;  %v1685_v50 = vadd.f32 %v1666_v46, %v641_v42  ;;  %v1562_v51 = vpop.f32.mrb[5].mxu0  ;;  %v1668_v52 = vpop.f32.mrb[5].mxu1  ;;  %v3538_v45 = vld [vmem:[%s3858_s1 + $0x10] ss:$8 sps:$4 sm:$0xff] (!%p3082_p13)  }
 0x1a5   : > { %v1684_v55 = vadd.f32 %v1562_v51, %v640_v43  ;;  %v1686_v56 = vadd.f32 %v1668_v52, %v642_v44  ;;  %v1564_v57 = vpop.f32.mrb[6].mxu0  ;;  %v1670_v58 = vpop.f32.mrb[6].mxu1  ;;  %v1711_v9 = vld [vmem:[#allocation2] sm:$0xff] (!%p3082_p13)  ;;  %v1713_v43 = vld [vmem:[#allocation2 + $0x10] sm:$0xff] (!%p3082_p13)  ;;  %2369 = vmatpush1.bf16.msra.mxu0 (!%p3082_p13), %v3538_v45 }
 0x1a6   : > { %1699 = vst [vmem:[#allocation2 + $0x40] sm:$0xff] %v1683_v49  ;;  %1701 = vst [vmem:[#allocation2 + $0x50] sm:$0xff] %v1685_v50  ;;  %v1687_v59 = vadd.f32 %v1564_v57, %v643_v47  ;;  %v1689_v60 = vadd.f32 %v1670_v58, %v645_v48  ;;  %v1566_v61 = vpop.f32.mrb[7].mxu0  ;;  %v1672_v62 = vpop.f32.mrb[7].mxu1  ;;  %v1712_v4 = vld [vmem:[#allocation2 + $0x8] sm:$0xff] (!%p3082_p13)  ;;  %v1749_v30 = vmul.f32 (!%p3082_p13), %v1732_v19, %v1711_v9  ;;  %v1714_v37 = vld [vmem:[#allocation2 + $0x18] sm:$0xff] (!%p3082_p13) }
 0x1a7   : > { %1700 = vst [vmem:[#allocation2 + $0x48] sm:$0xff] %v1684_v55  ;;  %1702 = vst [vmem:[#allocation2 + $0x58] sm:$0xff] %v1686_v56  ;;  %v1688_v63 = vadd.f32 %v1566_v61, %v644_v53  ;;  %v1690_v0 = vadd.f32 %v1672_v62, %v646_v54  ;;  %v1715_v10 = vld [vmem:[#allocation2 + $0x20] sm:$0xff] (!%p3082_p13)  ;;  %v1750_v28 = vmul.f32 (!%p3082_p13), %v1736_v17, %v1712_v4  ;;  %v1717_v44 = vld [vmem:[#allocation2 + $0x30] sm:$0xff] (!%p3082_p13) }
 0x1a8   : > { %1703 = vst [vmem:[#allocation2 + $0x60] sm:$0xff] %v1687_v59  ;;  %1705 = vst [vmem:[#allocation2 + $0x70] sm:$0xff] %v1689_v60  ;;  %v1716_v7 = vld [vmem:[#allocation2 + $0x28] sm:$0xff] (!%p3082_p13)  ;;  %v1753_v31 = vmul.f32 (!%p3082_p13), %v1732_v19, %v1715_v10  ;;  %v1718_v38 = vld [vmem:[#allocation2 + $0x38] sm:$0xff] (!%p3082_p13)  ;;  %v1787_v41 = vadd.f32 (!%p3082_p13), %v1770_v20, %v1749_v30  ;;  %v1755_v9 = vmul.f32 (!%p3082_p13), %v4044_v24, %v1717_v44 }
 0x1a9   : > { %1704 = vst [vmem:[#allocation2 + $0x68] sm:$0xff] %v1688_v63  ;;  %1706 = vst [vmem:[#allocation2 + $0x78] sm:$0xff] %v1690_v0  ;;  %v1754_v29 = vmul.f32 (!%p3082_p13), %v1736_v17, %v1716_v7  ;;  %v1788_v39 = vadd.f32 (!%p3082_p13), %v1774_v18, %v1750_v28  ;;  %v3539_v51 = vld [vmem:[%s3858_s1 + $0x24] ss:$8 sps:$4 sm:$0xff] (!%p3082_p13)   ;;  %v1752_v0 = vmul.f32 (!%p3082_p13), %v1744_v22, %v1714_v37  ;;  %v3541_v4 = vld [vmem:[%s3858_s1 + $0x20] ss:$8 sps:$4 sm:$0xff] (!%p3082_p13)  }
 0x1aa   : > { %v1791_v42 = vadd.f32 %v1770_v20, %v1753_v31  ;;  %v1803_v54 = vmax.f32 %v1787_v41, 0.0  ;;  %v1756_v1 = vmul.f32 %v1744_v22, %v1718_v38  ;;  %v1751_v7 = vmul.f32 %v4044_v24, %v1713_v43  ;;  %2370 = vmatprep.subr.bf16.mxu0 %v3539_v51  ;;  %v3542_v10 = vld [vmem:[%s3858_s1 + $0x34] ss:$8 sps:$4 sm:$0xff]   ;;  %v3544_v28 = vld [vmem:[%s3858_s1 + $0x30] ss:$8 sps:$4 sm:$0xff]  }
 0x1ab   : > { %v1792_v40 = vadd.f32 %v1774_v18, %v1754_v29  ;;  %v1804_v52 = vmax.f32 %v1788_v39, 0.0  ;;  %v1790_v12 = vadd.f32 %v4042_v23, %v1752_v0  ;;  %2371 = vmatpush1.bf16.msra.mxu0 %v3541_v4  ;;  %v3547_v38 = vld [vmem:[%s3858_s1 + $0x40] ss:$8 sps:$4 sm:$0xff]   ;;  %v3548_v39 = vld [vmem:[%s3858_s1 + $0x54] ss:$8 sps:$4 sm:$0xff]  }
 0x1ac   : > { %v1807_v55 = vmax.f32 %v1791_v42, 0.0  ;;  %v1789_v16 = vadd.f32 %v4046_v25, %v1751_v7  ;;  %2372 = vmatprep.subr.bf16.mxu0 %v3542_v10  ;;  %v3550_v41 = vld [vmem:[%s3858_s1 + $0x50] ss:$8 sps:$4 sm:$0xff]   ;;  %v3551_v42 = vld [vmem:[%s3858_s1 + $0x64] ss:$8 sps:$4 sm:$0xff]  }
 0x1ad   : > { %v1719_v15 = vld [vmem:[#allocation2 + $0x40] sm:$0xff]  ;;  %v1808_v53 = vmax.f32 %v1792_v40, 0.0  ;;  %v1721_v61 = vld [vmem:[#allocation2 + $0x50] sm:$0xff]  ;;  %v3636_v7 = vld [vmem:[%s3870_s26 + $0x18] sm:$0xff]  }
 0x1ae   : > { %v1720_v13 = vld [vmem:[#allocation2 + $0x48] sm:$0xff]  ;;  %v1757_v35 = vmul.f32 %v1732_v19, %v1719_v15  ;;  %v1722_v50 = vld [vmem:[#allocation2 + $0x58] sm:$0xff]  ;;  %v3234_v63 = vpack.c.bf16 %v1807_v55, %v1803_v54  ;;  %v3630_v0 = vld [vmem:[%s3870_s26] sm:$0xff]  }
 0x1af   : > { %v1723_v21 = vld [vmem:[#allocation2 + $0x60] sm:$0xff]  ;;  %v1758_v33 = vmul.f32 %v1736_v17, %v1720_v13  ;;  %v3232_v62 = vpack.c.bf16 %v1808_v53, %v1804_v52  ;;  %v1725_v3 = vld [vmem:[#allocation2 + $0x70] sm:$0xff]  ;;  %v1794_v13 = vadd.f32 %v4042_v23, %v1756_v1  ;;  %2373 = vmatpush1.bf16.msra.mxu0 %v3544_v28  ;;  %v3631_v1 = vld [vmem:[%s3870_s26 + $0x48] sm:$0xff]  }
 0x1b0   : > { %v1724_v14 = vld [vmem:[#allocation2 + $0x68] sm:$0xff]  ;;  %v1761_v36 = vmul.f32 %v1732_v19, %v1723_v21  ;;  %v1795_v48 = vadd.f32 %v1770_v20, %v1757_v35  ;;  %v1726_v60 = vld [vmem:[#allocation2 + $0x78] sm:$0xff]  ;;  %v1763_v19 = vmul.f32 %v4044_v24, %v1725_v3  ;;  %2374 = vmatprep.subr.bf16.mxu0 %v3545_v32  ;;  %v3633_v4 = vld [vmem:[%s3870_s26 + $0x50] sm:$0xff]  }
 0x1b1   : > { %v1762_v34 = vmul.f32 %v1736_v17, %v1724_v14  ;;  %v1796_v46 = vadd.f32 %v1774_v18, %v1758_v33  ;;  %3233 = vmatprep.subr.bf16.mxu1 %v3232_v62  ;;  %v1760_v14 = vmul.f32 %v1744_v22, %v1722_v50  ;;  %v1764_v15 = vmul.f32 %v1744_v22, %v1726_v60  ;;  %v3553_v43 = vld [vmem:[%s3858_s1 + $0x60] ss:$8 sps:$4 sm:$0xff]   ;;  %v3554_v44 = vld [vmem:[%s3858_s1 + $0x74] ss:$8 sps:$4 sm:$0xff]   ;;  %v3556_v45 = vld [vmem:[%s3858_s1 + $0x70] ss:$8 sps:$4 sm:$0xff]  }
 0x1b2   : > { %v1799_v49 = vadd.f32 %v1770_v20, %v1761_v36  ;;  %v1811_v58 = vmax.f32 %v1795_v48, 0.0  ;;  %3235 = vmatpush1.bf16.msra.mxu1 %v3234_v63  ;;  %v1793_v17 = vadd.f32 %v4046_v25, %v1755_v9  ;;  %v1806_v20 = vmax.f32 %v1790_v12, 0.0  ;;  %v3560_v48 = vld [vmem:[%s3858_s1 + $0x94] ss:$8 sps:$4 sm:$0xff]   ;;  %v3563_v50 = vld [vmem:[%s3858_s1 + $0xa4] ss:$8 sps:$4 sm:$0xff]  }
 0x1b3   : > { %v1800_v47 = vadd.f32 %v1774_v18, %v1762_v34  ;;  %v1812_v56 = vmax.f32 %v1796_v46, 0.0  ;;  %v1759_v18 = vmul.f32 %v4044_v24, %v1721_v61  ;;  %v1810_v21 = vmax.f32 %v1794_v13, 0.0  ;;  %2375 = vmatpush1.bf16.msra.mxu0 %v3547_v38  ;;  %v3557_v46 = vld [vmem:[%s3858_s1 + $0x84] ss:$8 sps:$4 sm:$0xff]   ;;  %v3565_v51 = vld [vmem:[%s3858_s1 + $0xa0] ss:$8 sps:$4 sm:$0xff]  }
 0x1b4   : > { %v1815_v59 = vmax.f32 %v1799_v49, 0.0  ;;  %v1798_v26 = vadd.f32 %v4042_v23, %v1760_v14  ;;  %v1802_v27 = vadd.f32 %v4042_v23, %v1764_v15  ;;  %v1805_v22 = vmax.f32 %v1789_v16, 0.0  ;;  %v1819_v23 = vld [vmem:[%s4233_s4] sm:$0x3]  ;;  %2376 = vmatprep.subr.bf16.mxu0 %v3548_v39  ;;  %v3562_v49 = vld [vmem:[%s3858_s1 + $0x90] ss:$8 sps:$4 sm:$0xff]  }
 0x1b5   : > { %v1816_v57 = vmax.f32 %v1800_v47, 0.0  ;;  %v1809_v29 = vmax.f32 %v1793_v17, 0.0  ;;  %v1797_v30 = vadd.f32 %v4046_v25, %v1759_v18  ;;  %v1801_v31 = vadd.f32 %v4046_v25, %v1763_v19  ;;  %v3559_v47 = vld [vmem:[%s3858_s1 + $0x80] ss:$8 sps:$4 sm:$0xff]   ;;  %v3566_v52 = vld [vmem:[%s3858_s1 + $0xb4] ss:$8 sps:$4 sm:$0xff]  }
 0x1b6   : > { %v3238_v6 = vpack.c.bf16 %v1815_v59, %v1811_v58  ;;  %v3240_v24 = vpack.c.bf16 %v1810_v21, %v1806_v20  ;;  %v1814_v33 = vmax.f32 %v1798_v26, 0.0  ;;  %v1818_v34 = vmax.f32 %v1802_v27, 0.0  ;;  %v3568_v53 = vld [vmem:[%s3858_s1 + $0xb0] ss:$8 sps:$4 sm:$0xff]   ;;  %v3569_v54 = vld [vmem:[%s3858_s1 + $0xc4] ss:$8 sps:$4 sm:$0xff]  }
 0x1b7   : > { %v3236_v5 = vpack.c.bf16 %v1816_v57, %v1812_v56  ;;  %v3242_v35 = vpack.c.bf16 %v1809_v29, %v1805_v22  ;;  %v1813_v36 = vmax.f32 %v1797_v30, 0.0  ;;  %v1817_v37 = vmax.f32 %v1801_v31, 0.0  ;;  %2377 = vmatpush1.bf16.msra.mxu0 %v3550_v41  ;;  %v3571_v55 = vld [vmem:[%s3858_s1 + $0xc0] ss:$8 sps:$4 sm:$0xff]   ;;  %v3572_v56 = vld [vmem:[%s3858_s1 + $0xd4] ss:$8 sps:$4 sm:$0xff]  }
 0x1b8   : > { %v3244_v25 = vpack.c.bf16 %v1818_v34, %v1814_v33  ;;  %2378 = vmatprep.subr.bf16.mxu0 %v3551_v42  ;;  %v3574_v57 = vld [vmem:[%s3858_s1 + $0xd0] ss:$8 sps:$4 sm:$0xff]   ;;  %v3575_v58 = vld [vmem:[%s3858_s1 + $0xe4] ss:$8 sps:$4 sm:$0xff]   ;;  %v3577_v59 = vld [vmem:[%s3858_s1 + $0xe0] ss:$8 sps:$4 sm:$0xff]  }
 0x1b9   : > { %3237 = vmatprep.subr.bf16.mxu1 %v3236_v5  ;;  %v3246_v40 = vpack.c.bf16 %v1817_v37, %v1813_v36  ;;  %v3578_v60 = vld [vmem:[%s3858_s1 + $0xf4] ss:$8 sps:$4 sm:$0xff]   ;;  %v3580_v61 = vld [vmem:[%s3858_s1 + $0xf0] ss:$8 sps:$4 sm:$0xff]   ;;  %v3583_v62 = vld [vmem:[%s3858_s1 + $0x104] ss:$8 sps:$4 sm:$0xff]  }
 0x1ba   : > { %3239 = vmatpush1.bf16.msra.mxu1 %v3238_v6  ;;  %v3629_v63 = vld [vmem:[%s3870_s26 + $0x40] sm:$0xff]   ;;  %v3632_v3 = vld [vmem:[%s3870_s26 + $0x8] sm:$0xff]   ;;  %v3634_v5 = vld [vmem:[%s3870_s26 + $0x10] sm:$0xff]  }
 0x1bb   : > { %3241 = vmatprep.subr.bf16.mxu1 %v3240_v24  ;;  %2379 = vmatpush1.bf16.msra.mxu0 %v3553_v43  ;;  %v3635_v6 = vld [vmem:[%s3870_s26 + $0x58] sm:$0xff]   ;;  %v3637_v9 = vld [vmem:[%s3870_s26 + $0x60] sm:$0xff]   ;;  %v3639_v12 = vld [vmem:[%s3870_s26 + $0x68] sm:$0xff]  }
 0x1bc   : > { %2380 = vmatprep.subr.bf16.mxu0 %v3554_v44  ;;  %v3638_v10 = vld [vmem:[%s3870_s26 + $0x20] sm:$0xff]   ;;  %v3640_v13 = vld [vmem:[%s3870_s26 + $0x28] sm:$0xff]   ;;  %v3586_v19 = vld [vmem:[%s3858_s1 + $0x114] ss:$8 sps:$4 sm:$0xff]  }
 0x1bd   : > { %3083 = vmatmul.mubr.msk.f32.vlgmr.msra.gmra.mrb[0].mxu1 %vm1820_vm0, %v1819_v23  ;;  %v3581_v17 = vld [vmem:[%s3858_s1 + $0x100] ss:$8 sps:$4 sm:$0xff]   ;;  %v3584_v20 = vld [vmem:[%s3858_s1 + $0x110] ss:$8 sps:$4 sm:$0xff]   ;;  %v3589_v21 = vld [vmem:[%s3858_s1 + $0x124] ss:$8 sps:$4 sm:$0xff]  }
 0x1be   : > { %3243 = vmatpush1.bf16.msra.mxu1 %v3242_v35  ;;  %1959 = vmatprep.mubr.f32.mxu1 %v3710_v2  ;;  %v3587_v28 = vld [vmem:[%s3858_s1 + $0x120] ss:$8 sps:$4 sm:$0xff]   ;;  %v3592_v29 = vld [vmem:[%s3858_s1 + $0x134] ss:$8 sps:$4 sm:$0xff]   ;;  %v3590_v30 = vld [vmem:[%s3858_s1 + $0x130] ss:$8 sps:$4 sm:$0xff]  }
 0x1bf   : > { %3245 = vmatprep.subr.bf16.mxu1 %v3244_v25  ;;  %2381 = vmatpush1.bf16.msra.mxu0 %v3556_v45  ;;  %v3595_v31 = vld [vmem:[%s3858_s1 + $0x144] ss:$8 sps:$4 sm:$0xff]   ;;  %v3593_v32 = vld [vmem:[%s3858_s1 + $0x140] ss:$8 sps:$4 sm:$0xff]   ;;  %v3598_v24 = vld [vmem:[%s3858_s1 + $0x154] ss:$8 sps:$4 sm:$0xff]  }
 0x1c0   : > { %2382 = vmatprep.subr.bf16.mxu0 %v3557_v46  ;;  %v3596_v33 = vld [vmem:[%s3858_s1 + $0x150] ss:$8 sps:$4 sm:$0xff]   ;;  %v3601_v34 = vld [vmem:[%s3858_s1 + $0x164] ss:$8 sps:$4 sm:$0xff]   ;;  %v3604_v35 = vld [vmem:[%s3858_s1 + $0x174] ss:$8 sps:$4 sm:$0xff]  }
 0x1c1   : > { %v3602_v36 = vld [vmem:[%s3858_s1 + $0x170] ss:$8 sps:$4 sm:$0xff]   ;;  %v3607_v37 = vld [vmem:[%s3858_s1 + $0x184] ss:$8 sps:$4 sm:$0xff]   ;;  %v3605_v25 = vld [vmem:[%s3858_s1 + $0x180] ss:$8 sps:$4 sm:$0xff]  }
 0x1c2   : > { %3247 = vmatpush1.bf16.msra.mxu1 %v3246_v40  ;;  %v3610_v38 = vld [vmem:[%s3858_s1 + $0x194] ss:$8 sps:$4 sm:$0xff]   ;;  %v3608_v39 = vld [vmem:[%s3858_s1 + $0x190] ss:$8 sps:$4 sm:$0xff]   ;;  %v3613_v40 = vld [vmem:[%s3858_s1 + $0x1a4] ss:$8 sps:$4 sm:$0xff]  }
 0x1c3   : > { %2383 = vmatpush1.bf16.msra.mxu0 %v3559_v47  ;;  %3181 = vmatprep.subr.bf16.mxu1 %v3629_v63  ;;  %v3611_v41 = vld [vmem:[%s3858_s1 + $0x1a0] ss:$8 sps:$4 sm:$0xff]   ;;  %v3616_v42 = vld [vmem:[%s3858_s1 + $0x1b4] ss:$8 sps:$4 sm:$0xff]   ;;  %v3614_v43 = vld [vmem:[%s3858_s1 + $0x1b0] ss:$8 sps:$4 sm:$0xff]  }
 0x1c4   : > { %2384 = vmatprep.subr.bf16.mxu0 %v3560_v48  ;;  %v3619_v44 = vld [vmem:[%s3858_s1 + $0x1c4] ss:$8 sps:$4 sm:$0xff]   ;;  %v3617_v45 = vld [vmem:[%s3858_s1 + $0x1c0] ss:$8 sps:$4 sm:$0xff]   ;;  %v3622_v46 = vld [vmem:[%s3858_s1 + $0x1d4] ss:$8 sps:$4 sm:$0xff]  }
 0x1c5   : > { %3084 = vmatmul.mubr.msk.f32.vlgmr.msra.gmra.mrb[2].mxu1 %vm1820_vm0, %v1819_v23  ;;  %v3599_v23 = vld [vmem:[%s3858_s1 + $0x160] ss:$8 sps:$4 sm:$0xff]   ;;  %v3620_v47 = vld [vmem:[%s3858_s1 + $0x1d0] ss:$8 sps:$4 sm:$0xff]   ;;  %v3625_v48 = vld [vmem:[%s3858_s1 + $0x1e4] ss:$8 sps:$4 sm:$0xff]  }
 0x1c6   : > { %3182 = vmatpush3.bf16.msra.mxu1 %v3630_v0 }
 0x1c7   : > { %2385 = vmatpush1.bf16.msra.mxu0 %v3562_v49  ;;  %3183 = vmatprep.subr.bf16.mxu1 %v3631_v1  ;;  %v3623_v49 = vld [vmem:[%s3858_s1 + $0x1e0] ss:$8 sps:$4 sm:$0xff]  }
 0x1c8   : > { %2386 = vmatprep.subr.bf16.mxu0 %v3563_v50  ;;  %v3628_v50 = vld [vmem:[%s3858_s1 + $0x1f4] ss:$8 sps:$4 sm:$0xff]  }
 0x1ca   : > { %3184 = vmatpush3.bf16.msra.mxu1 %v3632_v3 }
 0x1cb   : > { %2387 = vmatpush1.bf16.msra.mxu0 %v3565_v51  ;;  %3185 = vmatprep.subr.bf16.mxu1 %v3633_v4  ;;  %v3626_v51 = vld [vmem:[%s3858_s1 + $0x1f0] ss:$8 sps:$4 sm:$0xff]  }
 0x1cc   : > { %2388 = vmatprep.subr.bf16.mxu0 %v3566_v52 }
 0x1ce   : > { %3186 = vmatpush3.bf16.msra.mxu1 %v3634_v5 }
 0x1cf   : > { %2389 = vmatpush1.bf16.msra.mxu0 %v3568_v53  ;;  %3187 = vmatprep.subr.bf16.mxu1 %v3635_v6  ;;  %v3641_v53 = vld [vmem:[%s3870_s26 + $0x70] sm:$0xff]   ;;  %v3645_v6 = vld [vmem:[%s3880_s27] sm:$0xff]  }
 0x1d0   : > { %2390 = vmatprep.subr.bf16.mxu0 %v3569_v54  ;;  %v3642_v54 = vld [vmem:[%s3870_s26 + $0x30] sm:$0xff]  }
 0x1d2   : > { %3188 = vmatpush3.bf16.msra.mxu1 %v3636_v7 }
 0x1d3   : > { %2391 = vmatpush1.bf16.msra.mxu0 %v3571_v55  ;;  %3189 = vmatprep.subr.bf16.mxu1 %v3637_v9  ;;  %v3643_v55 = vld [vmem:[%s3870_s26 + $0x78] sm:$0xff]  }
 0x1d4   : > { %2392 = vmatprep.subr.bf16.mxu0 %v3572_v56  ;;  %v3644_v56 = vld [vmem:[%s3870_s26 + $0x38] sm:$0xff]  }
 0x1d5   : > { %v3648_v9 = vld [vmem:[%s3880_s27 + $0x18] sm:$0xff]  }
 0x1d6   : > { %3190 = vmatpush3.bf16.msra.mxu1 %v3638_v10  ;;  %v3649_v10 = vld [vmem:[%s3880_s27 + $0x20] sm:$0xff]  }
 0x1d7   : > { %2393 = vmatpush1.bf16.msra.mxu0 %v3574_v57  ;;  %3191 = vmatprep.subr.bf16.mxu1 %v3639_v12  ;;  %v2034_v57 = vld [vmem:[%s3865_s0] sm:$0x3]  ;;  %v3650_v12 = vld [vmem:[%s3880_s27 + $0x28] sm:$0xff]  }
 0x1d8   : > { %2394 = vmatprep.subr.bf16.mxu0 %v3575_v58  ;;  %v2039_v58 = vrot.slane %v2034_v57, %v4036_v11  ;;  %v3646_v11 = vld [vmem:[%s3880_s27 + $0x8] sm:$0xff]  }
 0x1da   : > { %3192 = vmatpush3.bf16.msra.mxu1 %v3640_v13  ;;  %v3651_v13 = vld [vmem:[%s3880_s27 + $0x30] sm:$0xff]  }
 0x1db   : > { %2395 = vmatpush1.bf16.msra.mxu0 %v3577_v59  ;;  %3193 = vmatprep.subr.bf16.mxu1 %v3641_v53  ;;  %v2043_v59 = vrot.slane %v2034_v57, %v4034_v8  ;;  %v3647_v8 = vld [vmem:[%s3880_s27 + $0x10] sm:$0xff]  }
 0x1dc   : > { %2396 = vmatprep.subr.bf16.mxu0 %v3578_v60 }
 0x1de   : > { %3194 = vmatpush3.bf16.msra.mxu1 %v3642_v54 }
 0x1df   : > { %2397 = vmatpush1.bf16.msra.mxu0 %v3580_v61  ;;  %3195 = vmatprep.subr.bf16.mxu1 %v3643_v55 }
 0x1e0   : > { %2407 = vmatprep.subr.bf16.mxu0 %v3583_v62 }
 0x1e2   : > { %3196 = vmatpush3.bf16.msra.mxu1 %v3644_v56 }
 0x1e3   : > { %3212 = vmatprep.subr.bf16.mxu1 %v3710_v2 }
 0x290   : > { %v1890_v14 = vpop.f32.mrb[0].mxu1 }
 0x291   : > { %v1892_v15 = vpop.f32.mrb[1].mxu1  ;;  %v1966_v18 = vpack.c.bf16 %v1890_v14, %v1890_v14  ;;  %v3652_v14 = vld [vmem:[%s3880_s27 + $0x38] sm:$0xff]  }
 0x292   : > { %v1967_v16 = vpack.c.bf16 %v1892_v15, %v1892_v15 }
 0x294   : > { %2398 = vmatprep.mubr.bf16.mxu0 %v1967_v16  ;;  %v3149_v16 = vld [vmem:[%s597_s28] ss:$0 sm:$0xff] }
 0x295   : > { %2399 = vmatmul.mubr.bf16.vlgmr.msra.gmra.mrb[0].mxu0 %v1966_v18 }
 0x296   : > { %2408 = vmatpush1.bf16.msra.mxu0 %v3581_v17 }
 0x297   : > { %2409 = vmatprep.subr.bf16.mxu0 %v3586_v19 }
 0x298   : > { %v1961_v26 = vpop.f32.mrb[2].mxu1 }
 0x299   : > { %v1963_v27 = vpop.f32.mrb[3].mxu1  ;;  %v1968_v52 = vpack.c.bf16 %v1961_v26, %v1961_v26 }
 0x29a   : > { %2410 = vmatpush1.bf16.msra.mxu0 %v3584_v20  ;;  %v1969_v22 = vpack.c.bf16 %v1963_v27, %v1963_v27 }
 0x29b   : > { %2411 = vmatprep.subr.bf16.mxu0 %v3589_v21 }
 0x29c   : > { %2439 = vmatprep.mubr.bf16.mxu0 %v1969_v22 }
 0x29e   : > { %2412 = vmatpush1.bf16.msra.mxu0 %v3587_v28 }
 0x29f   : > { %2413 = vmatprep.subr.bf16.mxu0 %v3592_v29 }
 0x2a2   : > { %2414 = vmatpush1.bf16.msra.mxu0 %v3590_v30 }
 0x2a3   : > { %2415 = vmatprep.subr.bf16.mxu0 %v3595_v31 }
 0x2a6   : > { %2416 = vmatpush1.bf16.msra.mxu0 %v3593_v32 }
 0x2a7   : > { %2417 = vmatprep.subr.bf16.mxu0 %v3598_v24 }
 0x2aa   : > { %2418 = vmatpush1.bf16.msra.mxu0 %v3596_v33 }
 0x2ab   : > { %2419 = vmatprep.subr.bf16.mxu0 %v3601_v34 }
 0x2ae   : > { %2420 = vmatpush1.bf16.msra.mxu0 %v3599_v23 }
 0x2af   : > { %2421 = vmatprep.subr.bf16.mxu0 %v3604_v35 }
 0x2b2   : > { %2422 = vmatpush1.bf16.msra.mxu0 %v3602_v36 }
 0x2b3   : > { %2423 = vmatprep.subr.bf16.mxu0 %v3607_v37 }
 0x2b6   : > { %2424 = vmatpush1.bf16.msra.mxu0 %v3605_v25 }
 0x2b7   : > { %2425 = vmatprep.subr.bf16.mxu0 %v3610_v38 }
 0x2ba   : > { %2426 = vmatpush1.bf16.msra.mxu0 %v3608_v39 }
 0x2bb   : > { %2427 = vmatprep.subr.bf16.mxu0 %v3613_v40 }
 0x2be   : > { %2428 = vmatpush1.bf16.msra.mxu0 %v3611_v41 }
 0x2bf   : > { %2429 = vmatprep.subr.bf16.mxu0 %v3616_v42 }
 0x2c2   : > { %2430 = vmatpush1.bf16.msra.mxu0 %v3614_v43 }
 0x2c3   : > { %2431 = vmatprep.subr.bf16.mxu0 %v3619_v44 }
 0x2c6   : > { %2432 = vmatpush1.bf16.msra.mxu0 %v3617_v45 }
 0x2c7   : > { %2433 = vmatprep.subr.bf16.mxu0 %v3622_v46 }
 0x2ca   : > { %2434 = vmatpush1.bf16.msra.mxu0 %v3620_v47 }
 0x2cb   : > { %2435 = vmatprep.subr.bf16.mxu0 %v3625_v48 }
 0x2ce   : > { %2436 = vmatpush1.bf16.msra.mxu0 %v3623_v49 }
 0x2cf   : > { %2437 = vmatprep.subr.bf16.mxu0 %v3628_v50 }
 0x2d2   : > { %2438 = vmatpush1.bf16.msra.mxu0 %v3626_v51 }
 0x2d5   : > { %2440 = vmatmul.mubr.bf16.vlgmr.msra.gmra.mrb[0].mxu0 %v1968_v52 }
 0x3a8   : > { %v2441_v60 = vpop.f32.mrb[0].mxu0 }
 0x3a9   : > { %v3264_v61 = vadd.f32 %v2441_v60, %v2039_v58  ;;  %v2443_v62 = vpop.f32.mrb[1].mxu0 }
 0x3aa   : > { %v3265_v63 = vadd.f32 %v2443_v62, %v2043_v59  ;;  %v2445_v0 = vpop.f32.mrb[2].mxu0 }
 0x3ab   : > { %v2448_v1 = vmax.f32 %v3264_v61, 0.0  ;;  %v2446_v3 = vpop.f32.mrb[3].mxu0 }
 0x3ac   : > { %v2449_v4 = vmax.f32 %v3265_v63, 0.0 }
 0x3ad   : > { %v2450_v7 = vpack.c.bf16 %v2448_v1, %v2448_v1 }
 0x3ae   : > { %v2451_v5 = vpack.c.bf16 %v2449_v4, %v2449_v4 }
 0x3b0   : > { %2619 = vmatprep.mubr.bf16.mxu1 %v2451_v5 }
 0x3b1   : > { %2620 = vmatmul.mubr.bf16.vlgmr.msra.gmra.mrb[4].mxu1 %v2450_v7 }
 0x3b2   : > { %3213 = vmatpush3.bf16.msra.mxu1 %v3645_v6  ;;  %3228 = vmatprep.mubr.msk.bf16.mxu1 %vm3711_vm1, %v3710_v2 }
 0x3b3   : > { %3214 = vmatprep.subr.bf16.mxu1 %v3710_v2 }
 0x3b6   : > { %3215 = vmatpush3.bf16.msra.mxu1 %v3646_v11 }
 0x3b7   : > { %3216 = vmatprep.subr.bf16.mxu1 %v3710_v2 }
 0x3ba   : > { %3217 = vmatpush3.bf16.msra.mxu1 %v3647_v8 }
 0x3bb   : > { %3218 = vmatprep.subr.bf16.mxu1 %v3710_v2 }
 0x3be   : > { %3219 = vmatpush3.bf16.msra.mxu1 %v3648_v9 }
 0x3bf   : > { %3220 = vmatprep.subr.bf16.mxu1 %v3710_v2 }
 0x3c2   : > { %3221 = vmatpush3.bf16.msra.mxu1 %v3649_v10 }
 0x3c3   : > { %3222 = vmatprep.subr.bf16.mxu1 %v3710_v2 }
 0x3c6   : > { %3223 = vmatpush3.bf16.msra.mxu1 %v3650_v12 }
 0x3c7   : > { %3224 = vmatprep.subr.bf16.mxu1 %v3710_v2 }
 0x3ca   : > { %3225 = vmatpush3.bf16.msra.mxu1 %v3651_v13 }
 0x3cb   : > { %3226 = vmatprep.subr.bf16.mxu1 %v3710_v2  ;;  %v3166_v2 = vld [vmem:[%s605_s30] ss:$0 sm:$0xff] }
 0x3ce   : > { %3227 = vmatpush3.bf16.msra.mxu1 %v3652_v14 }
 0x484   : > { %v3197_v15 = vpop.f32.mrb[4].mxu1 }
 0x485   : > { %v3198_v17 = vpop.f32.mrb[5].mxu1 }
 0x486   : > { %v3199_v18 = vadd.f32 %v3198_v17, %v3197_v15  ;;  %v3200_v19 = vpop.f32.mrb[6].mxu1 }
 0x487   : > { %v3201_v20 = vpop.f32.mrb[7].mxu1 }
 0x488   : > { %v2622_v21 = vadd.f32 %v3199_v18, %v3149_v16 }
 0x48a   : > { %v2627_v26 = vmax.f32 %v2622_v21, 0.0 }
 0x48c   : > { %v2628_v27 = vpack.c.bf16 %v2627_v26, %v2627_v26 }
 0x48e   : > { %3229 = vmatmul.mubr.bf16.vlgmr.msra.gmra.mrb[8].mxu1 %v2628_v27 }
 0x561   : > { %v2734_v28 = vpop.f32.mrb[8].mxu1 }
 0x562   : > { %v2735_v22 = vadd.f32 %v3166_v2, %v2734_v28  ;;  %v3230_v29 = vpop.f32.mrb[9].mxu1 }
 0x563   : > { %v2737_v30 = vpop.f32.mrb[10].mxu1 }
 0x564   : > { %2740 = vst [vmem:[%s3889_s12] sm:$0x3] %v2735_v22  ;;  %v3231_v31 = vpop.f32.mrb[11].mxu1 }
 0x565 PF: > { %s4234_s25 = sld [smem:[#allocation7_spill]]  ;;  %s4235_s17 = sld [smem:[#allocation4_spill]] }
 0x566   : > { %s4236_s18 = sld [smem:[#allocation10_spill]]  ;;  %s4237_s19 = sld [smem:[#allocation5_spill]] }
 0x567   : > { %s4238_s20 = sld [smem:[#allocation6_spill]]  ;;  %s4239_s21 = sld [smem:[#allocation8_spill]] }
 0x568   : > { %s4240_s22 = sld [smem:[#allocation9_spill]] }
 0x56b   : > { %s21_s23 = sadd.s32 1, %s4234_s25  }
 0x56c   : > { %p18_p0 = scmp.ge.s32.totalorder %s21_s23, 14  }
 0x56e   :  { %20 = sbr.rel (!%p18_p0) target bundleno = 11 (0xb), region = 157 }

</bundles_post_ra>
